<compile_context>
chip_gen: v5e
topology: v5e:2x2
jax: 0.10.0
libtpu: 0.0.40
codegen_flags: <defaults>
</compile_context>

<pallas_src>
import functools
import numpy as np
import jax
import jax.numpy as jnp
from jax import lax
from jax.experimental import pallas as pl
from jax.experimental.pallas import tpu as pltpu

# ---- small synthetic configuration -----------------------------------------
B = 2              # batch size
S = 16             # BERT sequence length (synthetic text_embedded)
E = 32             # config.embedding_dim
L = 8              # max span length produced by get_so_embedded
H2 = 32            # config.lstm2_hidden_dim (bidirectional output width)
HD = H2 // 2       # hidden per LSTM direction
NUM_TAGS = 4       # config.num_tags
DIN = 4 * E        # BiLSTM input dim = 4 * embedding_dim  (= 128, lane dense)
G = 4 * HD         # gates per direction (= 64); 2*G = 128 lane dense
NB = 2 * B         # subject + object sequences processed together
NEG = -1000000000000000.0      # masked_fill value used in local_inference
NEG_POOL = -1.0e30             # mask value for max pooling


def _softmax_lastdim_approx(x):
    """Row softmax with approx reciprocal on the EUP (attention only)."""
    m = jnp.max(x, axis=-1, keepdims=True)
    ex = jnp.exp(x - m)
    s = jnp.sum(ex, axis=-1, keepdims=True)
    return ex * pl.reciprocal(s, approx=True)


# =============================================================================
# Fused kernel: span gather -> local_inference -> fused-BiLSTM+pooling -> head
# =============================================================================
def fused_esim_kernel(spans_ref,                    # SMEM (4*B,) int32
                      text_ref,                     # (B, S+L, E) padded text
                      wihT_ref,                     # (DIN, 2*G) gate-interleaved
                      whh_ref,                      # (2*HD, 2*G) block-diagonal
                      bias_ref,                     # (1, 2*G)
                      linwT_ref,                    # (4*H2, NUM_TAGS)
                      linb_ref,                     # (1, NUM_TAGS)
                      out_ref):                     # (B, NUM_TAGS)
    pos_col = lax.broadcasted_iota(jnp.int32, (L, 1), 0)   # (L, 1)
    pos_row = lax.broadcasted_iota(jnp.int32, (1, L), 1)   # (1, L)

    s_lens = [spans_ref[B + b] for b in range(B)]
    o_lens = [spans_ref[3 * B + b] for b in range(B)]

    # ---- span gather + local_inference (per-batch, statically unrolled) ----
    a_pieces, aw_pieces, b_pieces, bw_pieces = [], [], [], []
    dn = (((1,), (1,)), ((), ()))                  # contract dim1 x dim1: x @ y.T
    for b in range(B):
        s_start = spans_ref[b]
        o_start = spans_ref[2 * B + b]
        s_len = s_lens[b]
        o_len = o_lens[b]

        a_raw = text_ref[b, pl.ds(s_start, L), :]           # (L, E)
        b_raw = text_ref[b, pl.ds(o_start, L), :]           # (L, E)

        a = jnp.where(pos_col < s_len, a_raw, 0.0)          # zero-pad past span
        bb = jnp.where(pos_col < o_len, b_raw, 0.0)
        # +1.0 on valid keys (torch float-mask idiom); row-constant -> softmax-safe
        fa = jnp.where(pos_row < s_len, 1.0, NEG)
        fb = jnp.where(pos_row < o_len, 1.0, NEG)

        e = lax.dot_general(a, bb, dn, preferred_element_type=jnp.float32)   # a @ bb^T
        eT = lax.dot_general(bb, a, dn, preferred_element_type=jnp.float32)  # bb @ a^T
        wa = _softmax_lastdim_approx(e + fb)
        wb = _softmax_lastdim_approx(eT + fa)
        aw = jnp.dot(wa, bb, preferred_element_type=jnp.float32)
        bw = jnp.dot(wb, a, preferred_element_type=jnp.float32)

        a_pieces.append(a)
        aw_pieces.append(aw)
        b_pieces.append(bb)
        bw_pieces.append(bw)

    # sublane-stack: subjects first, then objects
    A = jnp.concatenate(a_pieces + b_pieces, axis=0)         # (NB*L, E)
    AW = jnp.concatenate(aw_pieces + bw_pieces, axis=0)      # (NB*L, E)

    # ---- K-split input projection (no 128-lane feature concat) -------------
    xw = (jnp.dot(A, wihT_ref[0:E, :], preferred_element_type=jnp.float32)
          + jnp.dot(AW, wihT_ref[E:2 * E, :], preferred_element_type=jnp.float32)
          + jnp.dot(A - AW, wihT_ref[2 * E:3 * E, :], preferred_element_type=jnp.float32)
          + jnp.dot(A * AW, wihT_ref[3 * E:4 * E, :], preferred_element_type=jnp.float32)
          + bias_ref[...])
    xw = xw.reshape(NB, L, 2 * G)                            # gate-interleaved lanes

    # per-row valid lengths (subjects then objects) as an (NB, 1) int vector
    zero11 = jnp.zeros((1, 1), jnp.int32)
    lens_i = jnp.concatenate([zero11 + s_lens[b] for b in range(B)]
                             + [zero11 + o_lens[b] for b in range(B)], axis=0)
    lens_f = lens_i.astype(jnp.float32)

    # lane masks (built once)
    hid_lane = lax.broadcasted_iota(jnp.int32, (1, 2 * HD), 1)
    hid_fwd = hid_lane < HD                                  # [h_f | h_b] layout
    g_lane = lax.broadcasted_iota(jnp.int32, (1, 2 * G), 1)
    g_fwd = (g_lane & HD) == 0                               # HD is a power of 2

    whh = whh_ref[...]                                       # (2*HD, 2*G)

    # ---- fused forward+backward LSTM with in-loop pooling -------------------
    h = jnp.zeros((NB, 2 * HD), jnp.float32)
    c = jnp.zeros((NB, 2 * HD), jnp.float32)
    sum_acc = jnp.zeros((NB, 2 * HD), jnp.float32)
    max_acc = jnp.full((NB, 2 * HD), NEG_POOL, jnp.float32)

    for k in range(L):                                       # static unroll
        # fwd half consumes time k, bwd half consumes time L-1-k
        gx = jnp.where(g_fwd, xw[:, k, :], xw[:, L - 1 - k, :])      # (NB, 2*G)
        g = gx + jnp.dot(h, whh, preferred_element_type=jnp.float32)
        sig = jax.nn.sigmoid(g[:, 0:3 * H2])                 # i|f|o, both dirs
        i_g = sig[:, 0:H2]
        f_g = sig[:, H2:2 * H2]
        o_g = sig[:, 2 * H2:3 * H2]
        g_g = jnp.tanh(g[:, 3 * H2:4 * H2])
        c_new = f_g * c + i_g * g_g
        h_new = o_g * jnp.tanh(c_new)

        t_idx = jnp.where(hid_fwd, k, L - 1 - k)             # (1, 2*HD) int32
        mask_k = t_idx < lens_i                              # (NB, 2*HD) bool
        h_out = jnp.where(mask_k, h_new, 0.0)
        sum_acc = sum_acc + h_out
        max_acc = jnp.maximum(max_acc, jnp.where(mask_k, h_new, NEG_POOL))
        h = jnp.where(mask_k, h_new, h)
        c = jnp.where(mask_k, c_new, c)

    # ---- pooling finalize (to batch-max length, as pad_packed_sequence) -----
    Ta = functools.reduce(jnp.maximum, s_lens)
    Tb = functools.reduce(jnp.maximum, o_lens)
    row_idx = lax.broadcasted_iota(jnp.int32, (NB, 1), 0)
    T_vec = jnp.where(row_idx < B, Ta, Tb).astype(jnp.float32)   # (NB, 1)

    ave = sum_acc / T_vec                                    # padded steps added 0
    # reference max-pool sees zero rows for elements shorter than the batch max
    maxp = jnp.where(lens_f < T_vec, jnp.maximum(max_acc, 0.0), max_acc)

    # ---- linear head, K-split over the [va_ave | va_max | vb_ave | vb_max] --
    linW = linwT_ref[...]                                    # (4*H2, NUM_TAGS)
    logits = (jnp.dot(ave[:B, :], linW[0:H2, :], preferred_element_type=jnp.float32)
              + jnp.dot(maxp[:B, :], linW[H2:2 * H2, :], preferred_element_type=jnp.float32)
              + jnp.dot(ave[B:, :], linW[2 * H2:3 * H2, :], preferred_element_type=jnp.float32)
              + jnp.dot(maxp[B:, :], linW[3 * H2:4 * H2, :], preferred_element_type=jnp.float32)
              + linb_ref[...])
    out_ref[...] = jax.nn.softmax(logits, axis=-1)           # exact (head)


@jax.jit
def fused_esim_pallas(spans, text_padded, wihT_all, whh_blk, bias_all,
                      linwT, linb):
    return pl.pallas_call(
        fused_esim_kernel,
        grid_spec=pltpu.PrefetchScalarGridSpec(
            num_scalar_prefetch=1,
            grid=(1,),
            in_specs=[
                pl.BlockSpec((B, S + L, E), lambda i, sp: (0, 0, 0)),
                pl.BlockSpec((DIN, 2 * G), lambda i, sp: (0, 0)),
                pl.BlockSpec((2 * HD, 2 * G), lambda i, sp: (0, 0)),
                pl.BlockSpec((1, 2 * G), lambda i, sp: (0, 0)),
                pl.BlockSpec((4 * H2, NUM_TAGS), lambda i, sp: (0, 0)),
                pl.BlockSpec((1, NUM_TAGS), lambda i, sp: (0, 0)),
            ],
            out_specs=pl.BlockSpec((B, NUM_TAGS), lambda i, sp: (0, 0)),
        ),
        out_shape=jax.ShapeDtypeStruct((B, NUM_TAGS), jnp.float32),
        compiler_params=pltpu.CompilerParams(
            dimension_semantics=("arbitrary",)),
    )(spans, text_padded, wihT_all, whh_blk, bias_all, linwT, linb)


# =============================================================================
# Parameter init (deterministic, torch-style uniform ranges)
# =============================================================================
def init_params(key):
    ks = jax.random.split(key, 10)
    k_lstm = 1.0 / np.sqrt(HD)
    k_lin = 1.0 / np.sqrt(4 * H2)

    def u(k, shape, scale):
        return jax.random.uniform(k, shape, jnp.float32, -scale, scale)

    return {
        'w_ih_f': u(ks[0], (4 * HD, DIN), k_lstm),
        'w_hh_f': u(ks[1], (4 * HD, HD), k_lstm),
        'b_ih_f': u(ks[2], (4 * HD,), k_lstm),
        'b_hh_f': u(ks[3], (4 * HD,), k_lstm),
        'w_ih_b': u(ks[4], (4 * HD, DIN), k_lstm),
        'w_hh_b': u(ks[5], (4 * HD, HD), k_lstm),
        'b_ih_b': u(ks[6], (4 * HD,), k_lstm),
        'b_hh_b': u(ks[7], (4 * HD,), k_lstm),
        'linear_w': u(ks[8], (NUM_TAGS, 4 * H2), k_lin),
        'linear_b': u(ks[9], (NUM_TAGS,), k_lin),
    }


# =============================================================================
# Host-side weight prep: gate/direction interleaving + block-diagonal W_hh
# =============================================================================
def _split_gate_cols(wT):
    """wT: (in_dim, 4*HD) with torch gate order [i, f, g, o] -> per-gate cols."""
    return (wT[:, 0:HD], wT[:, HD:2 * HD], wT[:, 2 * HD:3 * HD], wT[:, 3 * HD:4 * HD])


def prepare_weights(params):
    # lane order of the fused gate output: [i_f, i_b, f_f, f_b, o_f, o_b, g_f, g_b]
    iF, fF, gF, oF = _split_gate_cols(params['w_ih_f'].T)       # (DIN, HD) each
    iB, fB, gB, oB = _split_gate_cols(params['w_ih_b'].T)
    wihT_all = jnp.concatenate([iF, iB, fF, fB, oF, oB, gF, gB], axis=1)

    bf = (params['b_ih_f'] + params['b_hh_f']).reshape(1, 4 * HD)
    bbk = (params['b_ih_b'] + params['b_hh_b']).reshape(1, 4 * HD)
    biF, bfF, bgF, boF = _split_gate_cols(bf)
    biB, bfB, bgB, boB = _split_gate_cols(bbk)
    bias_all = jnp.concatenate([biF, biB, bfF, bfB, boF, boB, bgF, bgB], axis=1)

    hiF, hfF, hgF, hoF = _split_gate_cols(params['w_hh_f'].T)   # (HD, HD) each
    hiB, hfB, hgB, hoB = _split_gate_cols(params['w_hh_b'].T)
    Z = jnp.zeros((HD, HD), jnp.float32)
    top = jnp.concatenate([hiF, Z, hfF, Z, hoF, Z, hgF, Z], axis=1)   # h_f rows
    bot = jnp.concatenate([Z, hiB, Z, hfB, Z, hoB, Z, hgB], axis=1)   # h_b rows
    whh_blk = jnp.concatenate([top, bot], axis=0)                     # (2*HD, 2*G)

    linwT = params['linear_w'].T                                      # (4*H2, NUM_TAGS)
    linb = params['linear_b'].reshape(1, NUM_TAGS)
    return wihT_all, whh_blk, bias_all, linwT, linb


# =============================================================================
# Full forward: weight prep + single fused pallas_call
# =============================================================================
def simple_bert_esim_forward(text_embedded, so_pairs, params):
    # scalar span info for SMEM prefetch: [s_starts | s_lens | o_starts | o_lens]
    s_starts = [int(p[0][0]) for p in so_pairs]
    s_lens = [int(p[0][1] - p[0][0] + 1) for p in so_pairs]
    o_starts = [int(p[1][0]) for p in so_pairs]
    o_lens = [int(p[1][1] - p[1][0] + 1) for p in so_pairs]
    spans = jnp.asarray(s_starts + s_lens + o_starts + o_lens, jnp.int32)

    # pad the sequence axis by L so in-kernel pl.ds(start, L) is always in-bounds
    text_padded = jnp.pad(text_embedded, ((0, 0), (0, L), (0, 0)))

    wihT_all, whh_blk, bias_all, linwT, linb = prepare_weights(params)
    return fused_esim_pallas(spans, text_padded, wihT_all, whh_blk,
                             bias_all, linwT, linb)


# =============================================================================
# NumPy reference (mirrors the torch forward) for a correctness check
# =============================================================================
def np_get_so_embedded(text_np, so_pairs):
    s_enc = np.zeros((B, L, E), np.float32)
    o_enc = np.zeros((B, L, E), np.float32)
    s_masks = np.zeros((B, L), np.float32)
    o_masks = np.zeros((B, L), np.float32)
    for i, ((s0, s1), (o0, o1)) in enumerate(so_pairs):
        sl, ol = s1 - s0 + 1, o1 - o0 + 1
        s_enc[i, :sl] = text_np[i, s0:s1 + 1]
        o_enc[i, :ol] = text_np[i, o0:o1 + 1]
        s_masks[i, :sl] = 1.0
        o_masks[i, :ol] = 1.0
    return s_enc, o_enc, s_masks, o_masks


def reference_forward(text_np, so_pairs, params):
    a, b, ma, mb = np_get_so_embedded(text_np, so_pairs)
    a_lengths = [p[0][1] - p[0][0] + 1 for p in so_pairs]
    b_lengths = [p[1][1] - p[1][0] + 1 for p in so_pairs]

    def softmax(x, axis):
        m = x.max(axis=axis, keepdims=True)
        ex = np.exp(x - m)
        return ex / ex.sum(axis=axis, keepdims=True)

    fa = np.where(ma == 0, NEG, ma)
    fb = np.where(mb == 0, NEG, mb)
    e = a @ b.transpose(0, 2, 1)
    wa = softmax(e + fb[:, None, :], -1)
    wb = softmax(e.transpose(0, 2, 1) + fa[:, None, :], -1)
    aw, bw = wa @ b, wb @ a
    sa = np.concatenate([a, aw, a - aw, a * aw], -1)
    so = np.concatenate([b, bw, b - bw, b * bw], -1)

    def sig(x):
        return 1.0 / (1.0 + np.exp(-x))

    p = {k: np.asarray(v) for k, v in params.items()}

    def lstm_bidir(x, lengths):
        out = np.zeros((x.shape[0], x.shape[1], 2 * HD), np.float32)
        for bi in range(x.shape[0]):
            Lv = lengths[bi]
            h = np.zeros(HD); c = np.zeros(HD)
            for t in range(Lv):
                g = p['w_ih_f'] @ x[bi, t] + p['w_hh_f'] @ h + p['b_ih_f'] + p['b_hh_f']
                i_g, f_g = sig(g[:HD]), sig(g[HD:2 * HD])
                g_g, o_g = np.tanh(g[2 * HD:3 * HD]), sig(g[3 * HD:])
                c = f_g * c + i_g * g_g; h = o_g * np.tanh(c)
                out[bi, t, :HD] = h
            h = np.zeros(HD); c = np.zeros(HD)
            for t in range(Lv - 1, -1, -1):
                g = p['w_ih_b'] @ x[bi, t] + p['w_hh_b'] @ h + p['b_ih_b'] + p['b_hh_b']
                i_g, f_g = sig(g[:HD]), sig(g[HD:2 * HD])
                g_g, o_g = np.tanh(g[2 * HD:3 * HD]), sig(g[3 * HD:])
                c = f_g * c + i_g * g_g; h = o_g * np.tanh(c)
                out[bi, t, HD:] = h
        return out

    va = lstm_bidir(sa, a_lengths)[:, :max(a_lengths), :]
    vb = lstm_bidir(so, b_lengths)[:, :max(b_lengths), :]
    v = np.concatenate([va.mean(1), va.max(1), vb.mean(1), vb.max(1)], -1)
    logits = v @ p['linear_w'].T + p['linear_b']
    return softmax(logits, -1)


if __name__ == "__main__":
    key = jax.random.PRNGKey(0)
    k_emb, k_par = jax.random.split(key)

    # Stand-in for BertModel(...)['last_hidden_state']
    text_embedded = jax.random.normal(k_emb, (B, S, E), jnp.float32)
    # so_pairs: (subject_span, object_span) inclusive token indices; max span len == L
    so_pairs = [((1, 5), (7, 10)), ((2, 9), (3, 6))]
    params = init_params(k_par)

    y_hat = simple_bert_esim_forward(text_embedded, so_pairs, params)
    y_hat = jax.block_until_ready(y_hat)

    y_ref = reference_forward(np.asarray(text_embedded), so_pairs, params)
    np.testing.assert_allclose(np.asarray(y_hat), y_ref, rtol=2e-3, atol=2e-3)

    print("KERNEL_OK")
</pallas_src>

<mosaic_0001>
module attributes {stable_mosaic.version = 11 : i64} {
  func.func @fused_esim_kernel(%arg0: i32, %arg1: memref<8xi32, #tpu.memory_space<smem>>, %arg2: memref<2x24x32xf32, #tpu.memory_space<vmem>>, %arg3: memref<128x128xf32, #tpu.memory_space<vmem>>, %arg4: memref<32x128xf32, #tpu.memory_space<vmem>>, %arg5: memref<1x128xf32, #tpu.memory_space<vmem>>, %arg6: memref<128x4xf32, #tpu.memory_space<vmem>>, %arg7: memref<1x4xf32, #tpu.memory_space<vmem>>, %arg8: memref<2x4xf32, #tpu.memory_space<vmem>>) attributes {dimension_semantics = [#tpu.dimension_semantics<arbitrary>], iteration_bounds = array<i64: 1>, scalar_prefetch = 1 : i64, scratch_operands = 0 : i64, tpu.core_type = #tpu.core_type<tc>, window_params = [{pipeline_mode = #tpu.pipeline_mode<synchronous>, transform_indices = @transform_0, window_bounds = array<i64: 2, 24, 32>}, {pipeline_mode = #tpu.pipeline_mode<synchronous>, transform_indices = @transform_1, window_bounds = array<i64: 128, 128>}, {pipeline_mode = #tpu.pipeline_mode<synchronous>, transform_indices = @transform_2, window_bounds = array<i64: 32, 128>}, {pipeline_mode = #tpu.pipeline_mode<synchronous>, transform_indices = @transform_3, window_bounds = array<i64: 1, 128>}, {pipeline_mode = #tpu.pipeline_mode<synchronous>, transform_indices = @transform_4, window_bounds = array<i64: 128, 4>}, {pipeline_mode = #tpu.pipeline_mode<synchronous>, transform_indices = @transform_5, window_bounds = array<i64: 1, 4>}, {pipeline_mode = #tpu.pipeline_mode<synchronous>, transform_indices = @transform_6, window_bounds = array<i64: 2, 4>}]} {
    %0 = tpu.iota {dimensions = array<i32: 0>} : vector<8x1xi32>
    %1 = tpu.iota {dimensions = array<i32: 1>} : vector<1x8xi32>
    %c2 = arith.constant 2 : index
    %2 = memref.load %arg1[%c2] : memref<8xi32, #tpu.memory_space<smem>>
    %c3 = arith.constant 3 : index
    %3 = memref.load %arg1[%c3] : memref<8xi32, #tpu.memory_space<smem>>
    %c6 = arith.constant 6 : index
    %4 = memref.load %arg1[%c6] : memref<8xi32, #tpu.memory_space<smem>>
    %c7 = arith.constant 7 : index
    %5 = memref.load %arg1[%c7] : memref<8xi32, #tpu.memory_space<smem>>
    %c0 = arith.constant 0 : index
    %6 = memref.load %arg1[%c0] : memref<8xi32, #tpu.memory_space<smem>>
    %c4 = arith.constant 4 : index
    %7 = memref.load %arg1[%c4] : memref<8xi32, #tpu.memory_space<smem>>
    %c0_0 = arith.constant 0 : index
    %8 = arith.index_cast %6 : i32 to index
    %c0_1 = arith.constant 0 : index
    %9 = vector.load %arg2[%c0_0, %8, %c0_1] : memref<2x24x32xf32, #tpu.memory_space<vmem>>, vector<1x8x32xf32>
    %10 = vector.shape_cast %9 : vector<1x8x32xf32> to vector<8x32xf32>
    %c0_2 = arith.constant 0 : index
    %11 = arith.index_cast %7 : i32 to index
    %c0_3 = arith.constant 0 : index
    %12 = vector.load %arg2[%c0_2, %11, %c0_3] : memref<2x24x32xf32, #tpu.memory_space<vmem>>, vector<1x8x32xf32>
    %13 = vector.shape_cast %12 : vector<1x8x32xf32> to vector<8x32xf32>
    %14 = vector.broadcast %2 : i32 to vector<8x1xi32>
    %15 = arith.cmpi slt, %0, %14 : vector<8x1xi32>
    %cst = arith.constant 0.000000e+00 : f32
    %16 = vector.shape_cast %15 : vector<8x1xi1> to vector<8x1xi1>
    %17 = vector.broadcast %16 : vector<8x1xi1> to vector<8x32xi1>
    %18 = vector.broadcast %cst : f32 to vector<8x32xf32>
    %19 = arith.select %17, %10, %18 : vector<8x32xi1>, vector<8x32xf32>
    %20 = vector.broadcast %4 : i32 to vector<8x1xi32>
    %21 = arith.cmpi slt, %0, %20 : vector<8x1xi32>
    %cst_4 = arith.constant 0.000000e+00 : f32
    %22 = vector.shape_cast %21 : vector<8x1xi1> to vector<8x1xi1>
    %23 = vector.broadcast %22 : vector<8x1xi1> to vector<8x32xi1>
    %24 = vector.broadcast %cst_4 : f32 to vector<8x32xf32>
    %25 = arith.select %23, %13, %24 : vector<8x32xi1>, vector<8x32xf32>
    %26 = vector.broadcast %2 : i32 to vector<1x8xi32>
    %27 = arith.cmpi slt, %1, %26 : vector<1x8xi32>
    %cst_5 = arith.constant 1.000000e+00 : f32
    %cst_6 = arith.constant -9.99999986E+14 : f32
    %28 = vector.broadcast %cst_5 : f32 to vector<1x8xf32>
    %29 = vector.broadcast %cst_6 : f32 to vector<1x8xf32>
    %30 = arith.select %27, %28, %29 : vector<1x8xi1>, vector<1x8xf32>
    %31 = vector.broadcast %4 : i32 to vector<1x8xi32>
    %32 = arith.cmpi slt, %1, %31 : vector<1x8xi32>
    %cst_7 = arith.constant 1.000000e+00 : f32
    %cst_8 = arith.constant -9.99999986E+14 : f32
    %33 = vector.broadcast %cst_7 : f32 to vector<1x8xf32>
    %34 = vector.broadcast %cst_8 : f32 to vector<1x8xf32>
    %35 = arith.select %32, %33, %34 : vector<1x8xi1>, vector<1x8xf32>
    %cst_9 = arith.constant dense<0.000000e+00> : vector<8x8xf32>
    %36 = tpu.matmul %19, %25, %cst_9 {dimension_numbers = #tpu.dot_dimension_numbers<[1], [1], [0], [0], [0, 0, 1, 0], [], []>} : vector<8x32xf32>, vector<8x32xf32>, vector<8x8xf32> -> vector<8x8xf32>
    %cst_10 = arith.constant dense<0.000000e+00> : vector<8x8xf32>
    %37 = tpu.matmul %25, %19, %cst_10 {dimension_numbers = #tpu.dot_dimension_numbers<[1], [1], [0], [0], [0, 0, 1, 0], [], []>} : vector<8x32xf32>, vector<8x32xf32>, vector<8x8xf32> -> vector<8x8xf32>
    %38 = vector.broadcast %35 : vector<1x8xf32> to vector<8x8xf32>
    %39 = arith.addf %36, %38 : vector<8x8xf32>
    %cst_11 = arith.constant dense<0xFF800000> : vector<8xf32>
    %40 = vector.multi_reduction <maximumf>, %39, %cst_11 [1] : vector<8x8xf32> to vector<8xf32>
    %41 = vector.shape_cast %40 : vector<8xf32> to vector<8x1xf32>
    %42 = vector.broadcast %41 : vector<8x1xf32> to vector<8x8xf32>
    %43 = arith.subf %39, %42 : vector<8x8xf32>
    %44 = math.exp %43 : vector<8x8xf32>
    %cst_12 = arith.constant dense<0.000000e+00> : vector<8xf32>
    %45 = vector.multi_reduction <add>, %44, %cst_12 [1] : vector<8x8xf32> to vector<8xf32>
    %46 = vector.shape_cast %45 : vector<8xf32> to vector<8x1xf32>
    %47 = tpu.reciprocal %46 {approx = true} : vector<8x1xf32> -> vector<8x1xf32>
    %48 = vector.broadcast %47 : vector<8x1xf32> to vector<8x8xf32>
    %49 = arith.mulf %44, %48 : vector<8x8xf32>
    %50 = vector.broadcast %30 : vector<1x8xf32> to vector<8x8xf32>
    %51 = arith.addf %37, %50 : vector<8x8xf32>
    %cst_13 = arith.constant dense<0xFF800000> : vector<8xf32>
    %52 = vector.multi_reduction <maximumf>, %51, %cst_13 [1] : vector<8x8xf32> to vector<8xf32>
    %53 = vector.shape_cast %52 : vector<8xf32> to vector<8x1xf32>
    %54 = vector.broadcast %53 : vector<8x1xf32> to vector<8x8xf32>
    %55 = arith.subf %51, %54 : vector<8x8xf32>
    %56 = math.exp %55 : vector<8x8xf32>
    %cst_14 = arith.constant dense<0.000000e+00> : vector<8xf32>
    %57 = vector.multi_reduction <add>, %56, %cst_14 [1] : vector<8x8xf32> to vector<8xf32>
    %58 = vector.shape_cast %57 : vector<8xf32> to vector<8x1xf32>
    %59 = tpu.reciprocal %58 {approx = true} : vector<8x1xf32> -> vector<8x1xf32>
    %60 = vector.broadcast %59 : vector<8x1xf32> to vector<8x8xf32>
    %61 = arith.mulf %56, %60 : vector<8x8xf32>
    %cst_15 = arith.constant dense<0.000000e+00> : vector<8x32xf32>
    %62 = tpu.matmul %49, %25, %cst_15 {dimension_numbers = #tpu.dot_dimension_numbers<[1], [0], [0], [1], [0, 0, 1, 1], [], []>} : vector<8x8xf32>, vector<8x32xf32>, vector<8x32xf32> -> vector<8x32xf32>
    %cst_16 = arith.constant dense<0.000000e+00> : vector<8x32xf32>
    %63 = tpu.matmul %61, %19, %cst_16 {dimension_numbers = #tpu.dot_dimension_numbers<[1], [0], [0], [1], [0, 0, 1, 1], [], []>} : vector<8x8xf32>, vector<8x32xf32>, vector<8x32xf32> -> vector<8x32xf32>
    %c1 = arith.constant 1 : index
    %64 = memref.load %arg1[%c1] : memref<8xi32, #tpu.memory_space<smem>>
    %c5 = arith.constant 5 : index
    %65 = memref.load %arg1[%c5] : memref<8xi32, #tpu.memory_space<smem>>
    %c1_17 = arith.constant 1 : index
    %66 = arith.index_cast %64 : i32 to index
    %c0_18 = arith.constant 0 : index
    %67 = vector.load %arg2[%c1_17, %66, %c0_18] : memref<2x24x32xf32, #tpu.memory_space<vmem>>, vector<1x8x32xf32>
    %68 = vector.shape_cast %67 : vector<1x8x32xf32> to vector<8x32xf32>
    %c1_19 = arith.constant 1 : index
    %69 = arith.index_cast %65 : i32 to index
    %c0_20 = arith.constant 0 : index
    %70 = vector.load %arg2[%c1_19, %69, %c0_20] : memref<2x24x32xf32, #tpu.memory_space<vmem>>, vector<1x8x32xf32>
    %71 = vector.shape_cast %70 : vector<1x8x32xf32> to vector<8x32xf32>
    %72 = vector.broadcast %3 : i32 to vector<8x1xi32>
    %73 = arith.cmpi slt, %0, %72 : vector<8x1xi32>
    %cst_21 = arith.constant 0.000000e+00 : f32
    %74 = vector.shape_cast %73 : vector<8x1xi1> to vector<8x1xi1>
    %75 = vector.broadcast %74 : vector<8x1xi1> to vector<8x32xi1>
    %76 = vector.broadcast %cst_21 : f32 to vector<8x32xf32>
    %77 = arith.select %75, %68, %76 : vector<8x32xi1>, vector<8x32xf32>
    %78 = vector.broadcast %5 : i32 to vector<8x1xi32>
    %79 = arith.cmpi slt, %0, %78 : vector<8x1xi32>
    %cst_22 = arith.constant 0.000000e+00 : f32
    %80 = vector.shape_cast %79 : vector<8x1xi1> to vector<8x1xi1>
    %81 = vector.broadcast %80 : vector<8x1xi1> to vector<8x32xi1>
    %82 = vector.broadcast %cst_22 : f32 to vector<8x32xf32>
    %83 = arith.select %81, %71, %82 : vector<8x32xi1>, vector<8x32xf32>
    %84 = vector.broadcast %3 : i32 to vector<1x8xi32>
    %85 = arith.cmpi slt, %1, %84 : vector<1x8xi32>
    %cst_23 = arith.constant 1.000000e+00 : f32
    %cst_24 = arith.constant -9.99999986E+14 : f32
    %86 = vector.broadcast %cst_23 : f32 to vector<1x8xf32>
    %87 = vector.broadcast %cst_24 : f32 to vector<1x8xf32>
    %88 = arith.select %85, %86, %87 : vector<1x8xi1>, vector<1x8xf32>
    %89 = vector.broadcast %5 : i32 to vector<1x8xi32>
    %90 = arith.cmpi slt, %1, %89 : vector<1x8xi32>
    %cst_25 = arith.constant 1.000000e+00 : f32
    %cst_26 = arith.constant -9.99999986E+14 : f32
    %91 = vector.broadcast %cst_25 : f32 to vector<1x8xf32>
    %92 = vector.broadcast %cst_26 : f32 to vector<1x8xf32>
    %93 = arith.select %90, %91, %92 : vector<1x8xi1>, vector<1x8xf32>
    %cst_27 = arith.constant dense<0.000000e+00> : vector<8x8xf32>
    %94 = tpu.matmul %77, %83, %cst_27 {dimension_numbers = #tpu.dot_dimension_numbers<[1], [1], [0], [0], [0, 0, 1, 0], [], []>} : vector<8x32xf32>, vector<8x32xf32>, vector<8x8xf32> -> vector<8x8xf32>
    %cst_28 = arith.constant dense<0.000000e+00> : vector<8x8xf32>
    %95 = tpu.matmul %83, %77, %cst_28 {dimension_numbers = #tpu.dot_dimension_numbers<[1], [1], [0], [0], [0, 0, 1, 0], [], []>} : vector<8x32xf32>, vector<8x32xf32>, vector<8x8xf32> -> vector<8x8xf32>
    %96 = vector.broadcast %93 : vector<1x8xf32> to vector<8x8xf32>
    %97 = arith.addf %94, %96 : vector<8x8xf32>
    %cst_29 = arith.constant dense<0xFF800000> : vector<8xf32>
    %98 = vector.multi_reduction <maximumf>, %97, %cst_29 [1] : vector<8x8xf32> to vector<8xf32>
    %99 = vector.shape_cast %98 : vector<8xf32> to vector<8x1xf32>
    %100 = vector.broadcast %99 : vector<8x1xf32> to vector<8x8xf32>
    %101 = arith.subf %97, %100 : vector<8x8xf32>
    %102 = math.exp %101 : vector<8x8xf32>
    %cst_30 = arith.constant dense<0.000000e+00> : vector<8xf32>
    %103 = vector.multi_reduction <add>, %102, %cst_30 [1] : vector<8x8xf32> to vector<8xf32>
    %104 = vector.shape_cast %103 : vector<8xf32> to vector<8x1xf32>
    %105 = tpu.reciprocal %104 {approx = true} : vector<8x1xf32> -> vector<8x1xf32>
    %106 = vector.broadcast %105 : vector<8x1xf32> to vector<8x8xf32>
    %107 = arith.mulf %102, %106 : vector<8x8xf32>
    %108 = vector.broadcast %88 : vector<1x8xf32> to vector<8x8xf32>
    %109 = arith.addf %95, %108 : vector<8x8xf32>
    %cst_31 = arith.constant dense<0xFF800000> : vector<8xf32>
    %110 = vector.multi_reduction <maximumf>, %109, %cst_31 [1] : vector<8x8xf32> to vector<8xf32>
    %111 = vector.shape_cast %110 : vector<8xf32> to vector<8x1xf32>
    %112 = vector.broadcast %111 : vector<8x1xf32> to vector<8x8xf32>
    %113 = arith.subf %109, %112 : vector<8x8xf32>
    %114 = math.exp %113 : vector<8x8xf32>
    %cst_32 = arith.constant dense<0.000000e+00> : vector<8xf32>
    %115 = vector.multi_reduction <add>, %114, %cst_32 [1] : vector<8x8xf32> to vector<8xf32>
    %116 = vector.shape_cast %115 : vector<8xf32> to vector<8x1xf32>
    %117 = tpu.reciprocal %116 {approx = true} : vector<8x1xf32> -> vector<8x1xf32>
    %118 = vector.broadcast %117 : vector<8x1xf32> to vector<8x8xf32>
    %119 = arith.mulf %114, %118 : vector<8x8xf32>
    %cst_33 = arith.constant dense<0.000000e+00> : vector<8x32xf32>
    %120 = tpu.matmul %107, %83, %cst_33 {dimension_numbers = #tpu.dot_dimension_numbers<[1], [0], [0], [1], [0, 0, 1, 1], [], []>} : vector<8x8xf32>, vector<8x32xf32>, vector<8x32xf32> -> vector<8x32xf32>
    %cst_34 = arith.constant dense<0.000000e+00> : vector<8x32xf32>
    %121 = tpu.matmul %119, %77, %cst_34 {dimension_numbers = #tpu.dot_dimension_numbers<[1], [0], [0], [1], [0, 0, 1, 1], [], []>} : vector<8x8xf32>, vector<8x32xf32>, vector<8x32xf32> -> vector<8x32xf32>
    %122 = tpu.concatenate %19, %77, %25, %83 in 0 : vector<8x32xf32>, vector<8x32xf32>, vector<8x32xf32>, vector<8x32xf32> -> vector<32x32xf32>
    %123 = tpu.concatenate %62, %120, %63, %121 in 0 : vector<8x32xf32>, vector<8x32xf32>, vector<8x32xf32>, vector<8x32xf32> -> vector<32x32xf32>
    %c0_35 = arith.constant 0 : index
    %c0_36 = arith.constant 0 : index
    %124 = vector.load %arg3[%c0_35, %c0_36] : memref<128x128xf32, #tpu.memory_space<vmem>>, vector<32x128xf32>
    %cst_37 = arith.constant dense<0.000000e+00> : vector<32x128xf32>
    %125 = tpu.matmul %122, %124, %cst_37 {dimension_numbers = #tpu.dot_dimension_numbers<[1], [0], [0], [1], [0, 0, 1, 1], [], []>} : vector<32x32xf32>, vector<32x128xf32>, vector<32x128xf32> -> vector<32x128xf32>
    %c32 = arith.constant 32 : index
    %c0_38 = arith.constant 0 : index
    %126 = vector.load %arg3[%c32, %c0_38] : memref<128x128xf32, #tpu.memory_space<vmem>>, vector<32x128xf32>
    %cst_39 = arith.constant dense<0.000000e+00> : vector<32x128xf32>
    %127 = tpu.matmul %123, %126, %cst_39 {dimension_numbers = #tpu.dot_dimension_numbers<[1], [0], [0], [1], [0, 0, 1, 1], [], []>} : vector<32x32xf32>, vector<32x128xf32>, vector<32x128xf32> -> vector<32x128xf32>
    %128 = arith.addf %125, %127 : vector<32x128xf32>
    %129 = arith.subf %122, %123 : vector<32x32xf32>
    %c64 = arith.constant 64 : index
    %c0_40 = arith.constant 0 : index
    %130 = vector.load %arg3[%c64, %c0_40] : memref<128x128xf32, #tpu.memory_space<vmem>>, vector<32x128xf32>
    %cst_41 = arith.constant dense<0.000000e+00> : vector<32x128xf32>
    %131 = tpu.matmul %129, %130, %cst_41 {dimension_numbers = #tpu.dot_dimension_numbers<[1], [0], [0], [1], [0, 0, 1, 1], [], []>} : vector<32x32xf32>, vector<32x128xf32>, vector<32x128xf32> -> vector<32x128xf32>
    %132 = arith.addf %128, %131 : vector<32x128xf32>
    %133 = arith.mulf %122, %123 : vector<32x32xf32>
    %c96 = arith.constant 96 : index
    %c0_42 = arith.constant 0 : index
    %134 = vector.load %arg3[%c96, %c0_42] : memref<128x128xf32, #tpu.memory_space<vmem>>, vector<32x128xf32>
    %cst_43 = arith.constant dense<0.000000e+00> : vector<32x128xf32>
    %135 = tpu.matmul %133, %134, %cst_43 {dimension_numbers = #tpu.dot_dimension_numbers<[1], [0], [0], [1], [0, 0, 1, 1], [], []>} : vector<32x32xf32>, vector<32x128xf32>, vector<32x128xf32> -> vector<32x128xf32>
    %136 = arith.addf %132, %135 : vector<32x128xf32>
    %c0_44 = arith.constant 0 : index
    %c0_45 = arith.constant 0 : index
    %137 = vector.load %arg5[%c0_44, %c0_45] : memref<1x128xf32, #tpu.memory_space<vmem>>, vector<1x128xf32>
    %138 = vector.broadcast %137 : vector<1x128xf32> to vector<32x128xf32>
    %139 = arith.addf %136, %138 : vector<32x128xf32>
    %140 = vector.shape_cast %139 : vector<32x128xf32> to vector<4x8x128xf32>
    %c0_i32 = arith.constant 0 : i32
    %141 = vector.broadcast %c0_i32 : i32 to vector<1x1xi32>
    %142 = vector.broadcast %2 : i32 to vector<1x1xi32>
    %143 = arith.addi %141, %142 : vector<1x1xi32>
    %144 = vector.broadcast %3 : i32 to vector<1x1xi32>
    %145 = arith.addi %141, %144 : vector<1x1xi32>
    %146 = vector.broadcast %4 : i32 to vector<1x1xi32>
    %147 = arith.addi %141, %146 : vector<1x1xi32>
    %148 = vector.broadcast %5 : i32 to vector<1x1xi32>
    %149 = arith.addi %141, %148 : vector<1x1xi32>
    %150 = tpu.concatenate %143, %145, %147, %149 in 0 : vector<1x1xi32>, vector<1x1xi32>, vector<1x1xi32>, vector<1x1xi32> -> vector<4x1xi32>
    %151 = arith.sitofp %150 : vector<4x1xi32> to vector<4x1xf32>
    %152 = tpu.iota {dimensions = array<i32: 1>} : vector<1x32xi32>
    %c16_i32 = arith.constant 16 : i32
    %153 = vector.broadcast %c16_i32 : i32 to vector<1x32xi32>
    %154 = arith.cmpi slt, %152, %153 : vector<1x32xi32>
    %155 = tpu.iota {dimensions = array<i32: 1>} : vector<1x128xi32>
    %c16_i32_46 = arith.constant 16 : i32
    %156 = vector.broadcast %c16_i32_46 : i32 to vector<1x128xi32>
    %157 = arith.andi %155, %156 : vector<1x128xi32>
    %c0_i32_47 = arith.constant 0 : i32
    %158 = vector.broadcast %c0_i32_47 : i32 to vector<1x128xi32>
    %159 = arith.cmpi eq, %157, %158 : vector<1x128xi32>
    %c0_48 = arith.constant 0 : index
    %c0_49 = arith.constant 0 : index
    %160 = vector.load %arg4[%c0_48, %c0_49] : memref<32x128xf32, #tpu.memory_space<vmem>>, vector<32x128xf32>
    %cst_50 = arith.constant 0.000000e+00 : f32
    %161 = vector.broadcast %cst_50 : f32 to vector<4x32xf32>
    %cst_51 = arith.constant 0.000000e+00 : f32
    %162 = vector.broadcast %cst_51 : f32 to vector<4x32xf32>
    %cst_52 = arith.constant 0.000000e+00 : f32
    %163 = vector.broadcast %cst_52 : f32 to vector<4x32xf32>
    %cst_53 = arith.constant -1.000000e+30 : f32
    %164 = vector.broadcast %cst_53 : f32 to vector<4x32xf32>
    %165 = vector.extract_strided_slice %140 {offsets = [0, 0, 0], sizes = [4, 1, 128], strides = [1, 1, 1]} : vector<4x8x128xf32> to vector<4x1x128xf32>
    %166 = vector.shape_cast %165 : vector<4x1x128xf32> to vector<4x128xf32>
    %167 = vector.extract_strided_slice %140 {offsets = [0, 7, 0], sizes = [4, 1, 128], strides = [1, 1, 1]} : vector<4x8x128xf32> to vector<4x1x128xf32>
    %168 = vector.shape_cast %167 : vector<4x1x128xf32> to vector<4x128xf32>
    %169 = vector.shape_cast %159 : vector<1x128xi1> to vector<1x128xi1>
    %170 = vector.broadcast %169 : vector<1x128xi1> to vector<4x128xi1>
    %171 = arith.select %170, %166, %168 : vector<4x128xi1>, vector<4x128xf32>
    %cst_54 = arith.constant dense<0.000000e+00> : vector<4x128xf32>
    %172 = tpu.matmul %161, %160, %cst_54 {dimension_numbers = #tpu.dot_dimension_numbers<[1], [0], [0], [1], [0, 0, 1, 1], [], []>} : vector<4x32xf32>, vector<32x128xf32>, vector<4x128xf32> -> vector<4x128xf32>
    %173 = arith.addf %171, %172 : vector<4x128xf32>
    %174 = vector.extract_strided_slice %173 {offsets = [0, 0], sizes = [4, 96], strides = [1, 1]} : vector<4x128xf32> to vector<4x96xf32>
    %175 = arith.negf %174 : vector<4x96xf32>
    %176 = math.exp %175 : vector<4x96xf32>
    %cst_55 = arith.constant 1.000000e+00 : f32
    %177 = vector.broadcast %cst_55 : f32 to vector<4x96xf32>
    %178 = arith.addf %177, %176 : vector<4x96xf32>
    %179 = arith.divf %177, %178 : vector<4x96xf32>
    %180 = vector.extract_strided_slice %179 {offsets = [0, 0], sizes = [4, 32], strides = [1, 1]} : vector<4x96xf32> to vector<4x32xf32>
    %181 = vector.extract_strided_slice %179 {offsets = [0, 32], sizes = [4, 32], strides = [1, 1]} : vector<4x96xf32> to vector<4x32xf32>
    %182 = vector.extract_strided_slice %179 {offsets = [0, 64], sizes = [4, 32], strides = [1, 1]} : vector<4x96xf32> to vector<4x32xf32>
    %183 = vector.extract_strided_slice %173 {offsets = [0, 96], sizes = [4, 32], strides = [1, 1]} : vector<4x128xf32> to vector<4x32xf32>
    %184 = math.tanh %183 : vector<4x32xf32>
    %185 = arith.mulf %181, %162 : vector<4x32xf32>
    %186 = arith.mulf %180, %184 : vector<4x32xf32>
    %187 = arith.addf %185, %186 : vector<4x32xf32>
    %188 = math.tanh %187 : vector<4x32xf32>
    %189 = arith.mulf %182, %188 : vector<4x32xf32>
    %c0_i32_56 = arith.constant 0 : i32
    %c7_i32 = arith.constant 7 : i32
    %190 = vector.broadcast %c0_i32_56 : i32 to vector<1x32xi32>
    %191 = vector.broadcast %c7_i32 : i32 to vector<1x32xi32>
    %192 = arith.select %154, %190, %191 : vector<1x32xi1>, vector<1x32xi32>
    %193 = vector.broadcast %192 : vector<1x32xi32> to vector<4x32xi32>
    %194 = vector.broadcast %150 : vector<4x1xi32> to vector<4x32xi32>
    %195 = arith.cmpi slt, %193, %194 : vector<4x32xi32>
    %cst_57 = arith.constant 0.000000e+00 : f32
    %196 = vector.broadcast %cst_57 : f32 to vector<4x32xf32>
    %197 = arith.select %195, %189, %196 : vector<4x32xi1>, vector<4x32xf32>
    %198 = arith.addf %163, %197 : vector<4x32xf32>
    %cst_58 = arith.constant -1.000000e+30 : f32
    %199 = vector.broadcast %cst_58 : f32 to vector<4x32xf32>
    %200 = arith.select %195, %189, %199 : vector<4x32xi1>, vector<4x32xf32>
    %201 = arith.maximumf %164, %200 : vector<4x32xf32>
    %202 = arith.select %195, %189, %161 : vector<4x32xi1>, vector<4x32xf32>
    %203 = arith.select %195, %187, %162 : vector<4x32xi1>, vector<4x32xf32>
    %204 = vector.extract_strided_slice %140 {offsets = [0, 1, 0], sizes = [4, 1, 128], strides = [1, 1, 1]} : vector<4x8x128xf32> to vector<4x1x128xf32>
    %205 = vector.shape_cast %204 : vector<4x1x128xf32> to vector<4x128xf32>
    %206 = vector.extract_strided_slice %140 {offsets = [0, 6, 0], sizes = [4, 1, 128], strides = [1, 1, 1]} : vector<4x8x128xf32> to vector<4x1x128xf32>
    %207 = vector.shape_cast %206 : vector<4x1x128xf32> to vector<4x128xf32>
    %208 = vector.shape_cast %159 : vector<1x128xi1> to vector<1x128xi1>
    %209 = vector.broadcast %208 : vector<1x128xi1> to vector<4x128xi1>
    %210 = arith.select %209, %205, %207 : vector<4x128xi1>, vector<4x128xf32>
    %cst_59 = arith.constant dense<0.000000e+00> : vector<4x128xf32>
    %211 = tpu.matmul %202, %160, %cst_59 {dimension_numbers = #tpu.dot_dimension_numbers<[1], [0], [0], [1], [0, 0, 1, 1], [], []>} : vector<4x32xf32>, vector<32x128xf32>, vector<4x128xf32> -> vector<4x128xf32>
    %212 = arith.addf %210, %211 : vector<4x128xf32>
    %213 = vector.extract_strided_slice %212 {offsets = [0, 0], sizes = [4, 96], strides = [1, 1]} : vector<4x128xf32> to vector<4x96xf32>
    %214 = arith.negf %213 : vector<4x96xf32>
    %215 = math.exp %214 : vector<4x96xf32>
    %cst_60 = arith.constant 1.000000e+00 : f32
    %216 = vector.broadcast %cst_60 : f32 to vector<4x96xf32>
    %217 = arith.addf %216, %215 : vector<4x96xf32>
    %218 = arith.divf %216, %217 : vector<4x96xf32>
    %219 = vector.extract_strided_slice %218 {offsets = [0, 0], sizes = [4, 32], strides = [1, 1]} : vector<4x96xf32> to vector<4x32xf32>
    %220 = vector.extract_strided_slice %218 {offsets = [0, 32], sizes = [4, 32], strides = [1, 1]} : vector<4x96xf32> to vector<4x32xf32>
    %221 = vector.extract_strided_slice %218 {offsets = [0, 64], sizes = [4, 32], strides = [1, 1]} : vector<4x96xf32> to vector<4x32xf32>
    %222 = vector.extract_strided_slice %212 {offsets = [0, 96], sizes = [4, 32], strides = [1, 1]} : vector<4x128xf32> to vector<4x32xf32>
    %223 = math.tanh %222 : vector<4x32xf32>
    %224 = arith.mulf %220, %203 : vector<4x32xf32>
    %225 = arith.mulf %219, %223 : vector<4x32xf32>
    %226 = arith.addf %224, %225 : vector<4x32xf32>
    %227 = math.tanh %226 : vector<4x32xf32>
    %228 = arith.mulf %221, %227 : vector<4x32xf32>
    %c1_i32 = arith.constant 1 : i32
    %c6_i32 = arith.constant 6 : i32
    %229 = vector.broadcast %c1_i32 : i32 to vector<1x32xi32>
    %230 = vector.broadcast %c6_i32 : i32 to vector<1x32xi32>
    %231 = arith.select %154, %229, %230 : vector<1x32xi1>, vector<1x32xi32>
    %232 = vector.broadcast %231 : vector<1x32xi32> to vector<4x32xi32>
    %233 = vector.broadcast %150 : vector<4x1xi32> to vector<4x32xi32>
    %234 = arith.cmpi slt, %232, %233 : vector<4x32xi32>
    %cst_61 = arith.constant 0.000000e+00 : f32
    %235 = vector.broadcast %cst_61 : f32 to vector<4x32xf32>
    %236 = arith.select %234, %228, %235 : vector<4x32xi1>, vector<4x32xf32>
    %237 = arith.addf %198, %236 : vector<4x32xf32>
    %cst_62 = arith.constant -1.000000e+30 : f32
    %238 = vector.broadcast %cst_62 : f32 to vector<4x32xf32>
    %239 = arith.select %234, %228, %238 : vector<4x32xi1>, vector<4x32xf32>
    %240 = arith.maximumf %201, %239 : vector<4x32xf32>
    %241 = arith.select %234, %228, %202 : vector<4x32xi1>, vector<4x32xf32>
    %242 = arith.select %234, %226, %203 : vector<4x32xi1>, vector<4x32xf32>
    %243 = vector.extract_strided_slice %140 {offsets = [0, 2, 0], sizes = [4, 1, 128], strides = [1, 1, 1]} : vector<4x8x128xf32> to vector<4x1x128xf32>
    %244 = vector.shape_cast %243 : vector<4x1x128xf32> to vector<4x128xf32>
    %245 = vector.extract_strided_slice %140 {offsets = [0, 5, 0], sizes = [4, 1, 128], strides = [1, 1, 1]} : vector<4x8x128xf32> to vector<4x1x128xf32>
    %246 = vector.shape_cast %245 : vector<4x1x128xf32> to vector<4x128xf32>
    %247 = vector.shape_cast %159 : vector<1x128xi1> to vector<1x128xi1>
    %248 = vector.broadcast %247 : vector<1x128xi1> to vector<4x128xi1>
    %249 = arith.select %248, %244, %246 : vector<4x128xi1>, vector<4x128xf32>
    %cst_63 = arith.constant dense<0.000000e+00> : vector<4x128xf32>
    %250 = tpu.matmul %241, %160, %cst_63 {dimension_numbers = #tpu.dot_dimension_numbers<[1], [0], [0], [1], [0, 0, 1, 1], [], []>} : vector<4x32xf32>, vector<32x128xf32>, vector<4x128xf32> -> vector<4x128xf32>
    %251 = arith.addf %249, %250 : vector<4x128xf32>
    %252 = vector.extract_strided_slice %251 {offsets = [0, 0], sizes = [4, 96], strides = [1, 1]} : vector<4x128xf32> to vector<4x96xf32>
    %253 = arith.negf %252 : vector<4x96xf32>
    %254 = math.exp %253 : vector<4x96xf32>
    %cst_64 = arith.constant 1.000000e+00 : f32
    %255 = vector.broadcast %cst_64 : f32 to vector<4x96xf32>
    %256 = arith.addf %255, %254 : vector<4x96xf32>
    %257 = arith.divf %255, %256 : vector<4x96xf32>
    %258 = vector.extract_strided_slice %257 {offsets = [0, 0], sizes = [4, 32], strides = [1, 1]} : vector<4x96xf32> to vector<4x32xf32>
    %259 = vector.extract_strided_slice %257 {offsets = [0, 32], sizes = [4, 32], strides = [1, 1]} : vector<4x96xf32> to vector<4x32xf32>
    %260 = vector.extract_strided_slice %257 {offsets = [0, 64], sizes = [4, 32], strides = [1, 1]} : vector<4x96xf32> to vector<4x32xf32>
    %261 = vector.extract_strided_slice %251 {offsets = [0, 96], sizes = [4, 32], strides = [1, 1]} : vector<4x128xf32> to vector<4x32xf32>
    %262 = math.tanh %261 : vector<4x32xf32>
    %263 = arith.mulf %259, %242 : vector<4x32xf32>
    %264 = arith.mulf %258, %262 : vector<4x32xf32>
    %265 = arith.addf %263, %264 : vector<4x32xf32>
    %266 = math.tanh %265 : vector<4x32xf32>
    %267 = arith.mulf %260, %266 : vector<4x32xf32>
    %c2_i32 = arith.constant 2 : i32
    %c5_i32 = arith.constant 5 : i32
    %268 = vector.broadcast %c2_i32 : i32 to vector<1x32xi32>
    %269 = vector.broadcast %c5_i32 : i32 to vector<1x32xi32>
    %270 = arith.select %154, %268, %269 : vector<1x32xi1>, vector<1x32xi32>
    %271 = vector.broadcast %270 : vector<1x32xi32> to vector<4x32xi32>
    %272 = vector.broadcast %150 : vector<4x1xi32> to vector<4x32xi32>
    %273 = arith.cmpi slt, %271, %272 : vector<4x32xi32>
    %cst_65 = arith.constant 0.000000e+00 : f32
    %274 = vector.broadcast %cst_65 : f32 to vector<4x32xf32>
    %275 = arith.select %273, %267, %274 : vector<4x32xi1>, vector<4x32xf32>
    %276 = arith.addf %237, %275 : vector<4x32xf32>
    %cst_66 = arith.constant -1.000000e+30 : f32
    %277 = vector.broadcast %cst_66 : f32 to vector<4x32xf32>
    %278 = arith.select %273, %267, %277 : vector<4x32xi1>, vector<4x32xf32>
    %279 = arith.maximumf %240, %278 : vector<4x32xf32>
    %280 = arith.select %273, %267, %241 : vector<4x32xi1>, vector<4x32xf32>
    %281 = arith.select %273, %265, %242 : vector<4x32xi1>, vector<4x32xf32>
    %282 = vector.extract_strided_slice %140 {offsets = [0, 3, 0], sizes = [4, 1, 128], strides = [1, 1, 1]} : vector<4x8x128xf32> to vector<4x1x128xf32>
    %283 = vector.shape_cast %282 : vector<4x1x128xf32> to vector<4x128xf32>
    %284 = vector.extract_strided_slice %140 {offsets = [0, 4, 0], sizes = [4, 1, 128], strides = [1, 1, 1]} : vector<4x8x128xf32> to vector<4x1x128xf32>
    %285 = vector.shape_cast %284 : vector<4x1x128xf32> to vector<4x128xf32>
    %286 = vector.shape_cast %159 : vector<1x128xi1> to vector<1x128xi1>
    %287 = vector.broadcast %286 : vector<1x128xi1> to vector<4x128xi1>
    %288 = arith.select %287, %283, %285 : vector<4x128xi1>, vector<4x128xf32>
    %cst_67 = arith.constant dense<0.000000e+00> : vector<4x128xf32>
    %289 = tpu.matmul %280, %160, %cst_67 {dimension_numbers = #tpu.dot_dimension_numbers<[1], [0], [0], [1], [0, 0, 1, 1], [], []>} : vector<4x32xf32>, vector<32x128xf32>, vector<4x128xf32> -> vector<4x128xf32>
    %290 = arith.addf %288, %289 : vector<4x128xf32>
    %291 = vector.extract_strided_slice %290 {offsets = [0, 0], sizes = [4, 96], strides = [1, 1]} : vector<4x128xf32> to vector<4x96xf32>
    %292 = arith.negf %291 : vector<4x96xf32>
    %293 = math.exp %292 : vector<4x96xf32>
    %cst_68 = arith.constant 1.000000e+00 : f32
    %294 = vector.broadcast %cst_68 : f32 to vector<4x96xf32>
    %295 = arith.addf %294, %293 : vector<4x96xf32>
    %296 = arith.divf %294, %295 : vector<4x96xf32>
    %297 = vector.extract_strided_slice %296 {offsets = [0, 0], sizes = [4, 32], strides = [1, 1]} : vector<4x96xf32> to vector<4x32xf32>
    %298 = vector.extract_strided_slice %296 {offsets = [0, 32], sizes = [4, 32], strides = [1, 1]} : vector<4x96xf32> to vector<4x32xf32>
    %299 = vector.extract_strided_slice %296 {offsets = [0, 64], sizes = [4, 32], strides = [1, 1]} : vector<4x96xf32> to vector<4x32xf32>
    %300 = vector.extract_strided_slice %290 {offsets = [0, 96], sizes = [4, 32], strides = [1, 1]} : vector<4x128xf32> to vector<4x32xf32>
    %301 = math.tanh %300 : vector<4x32xf32>
    %302 = arith.mulf %298, %281 : vector<4x32xf32>
    %303 = arith.mulf %297, %301 : vector<4x32xf32>
    %304 = arith.addf %302, %303 : vector<4x32xf32>
    %305 = math.tanh %304 : vector<4x32xf32>
    %306 = arith.mulf %299, %305 : vector<4x32xf32>
    %c3_i32 = arith.constant 3 : i32
    %c4_i32 = arith.constant 4 : i32
    %307 = vector.broadcast %c3_i32 : i32 to vector<1x32xi32>
    %308 = vector.broadcast %c4_i32 : i32 to vector<1x32xi32>
    %309 = arith.select %154, %307, %308 : vector<1x32xi1>, vector<1x32xi32>
    %310 = vector.broadcast %309 : vector<1x32xi32> to vector<4x32xi32>
    %311 = vector.broadcast %150 : vector<4x1xi32> to vector<4x32xi32>
    %312 = arith.cmpi slt, %310, %311 : vector<4x32xi32>
    %cst_69 = arith.constant 0.000000e+00 : f32
    %313 = vector.broadcast %cst_69 : f32 to vector<4x32xf32>
    %314 = arith.select %312, %306, %313 : vector<4x32xi1>, vector<4x32xf32>
    %315 = arith.addf %276, %314 : vector<4x32xf32>
    %cst_70 = arith.constant -1.000000e+30 : f32
    %316 = vector.broadcast %cst_70 : f32 to vector<4x32xf32>
    %317 = arith.select %312, %306, %316 : vector<4x32xi1>, vector<4x32xf32>
    %318 = arith.maximumf %279, %317 : vector<4x32xf32>
    %319 = arith.select %312, %306, %280 : vector<4x32xi1>, vector<4x32xf32>
    %320 = arith.select %312, %304, %281 : vector<4x32xi1>, vector<4x32xf32>
    %321 = vector.extract_strided_slice %140 {offsets = [0, 4, 0], sizes = [4, 1, 128], strides = [1, 1, 1]} : vector<4x8x128xf32> to vector<4x1x128xf32>
    %322 = vector.shape_cast %321 : vector<4x1x128xf32> to vector<4x128xf32>
    %323 = vector.extract_strided_slice %140 {offsets = [0, 3, 0], sizes = [4, 1, 128], strides = [1, 1, 1]} : vector<4x8x128xf32> to vector<4x1x128xf32>
    %324 = vector.shape_cast %323 : vector<4x1x128xf32> to vector<4x128xf32>
    %325 = vector.shape_cast %159 : vector<1x128xi1> to vector<1x128xi1>
    %326 = vector.broadcast %325 : vector<1x128xi1> to vector<4x128xi1>
    %327 = arith.select %326, %322, %324 : vector<4x128xi1>, vector<4x128xf32>
    %cst_71 = arith.constant dense<0.000000e+00> : vector<4x128xf32>
    %328 = tpu.matmul %319, %160, %cst_71 {dimension_numbers = #tpu.dot_dimension_numbers<[1], [0], [0], [1], [0, 0, 1, 1], [], []>} : vector<4x32xf32>, vector<32x128xf32>, vector<4x128xf32> -> vector<4x128xf32>
    %329 = arith.addf %327, %328 : vector<4x128xf32>
    %330 = vector.extract_strided_slice %329 {offsets = [0, 0], sizes = [4, 96], strides = [1, 1]} : vector<4x128xf32> to vector<4x96xf32>
    %331 = arith.negf %330 : vector<4x96xf32>
    %332 = math.exp %331 : vector<4x96xf32>
    %cst_72 = arith.constant 1.000000e+00 : f32
    %333 = vector.broadcast %cst_72 : f32 to vector<4x96xf32>
    %334 = arith.addf %333, %332 : vector<4x96xf32>
    %335 = arith.divf %333, %334 : vector<4x96xf32>
    %336 = vector.extract_strided_slice %335 {offsets = [0, 0], sizes = [4, 32], strides = [1, 1]} : vector<4x96xf32> to vector<4x32xf32>
    %337 = vector.extract_strided_slice %335 {offsets = [0, 32], sizes = [4, 32], strides = [1, 1]} : vector<4x96xf32> to vector<4x32xf32>
    %338 = vector.extract_strided_slice %335 {offsets = [0, 64], sizes = [4, 32], strides = [1, 1]} : vector<4x96xf32> to vector<4x32xf32>
    %339 = vector.extract_strided_slice %329 {offsets = [0, 96], sizes = [4, 32], strides = [1, 1]} : vector<4x128xf32> to vector<4x32xf32>
    %340 = math.tanh %339 : vector<4x32xf32>
    %341 = arith.mulf %337, %320 : vector<4x32xf32>
    %342 = arith.mulf %336, %340 : vector<4x32xf32>
    %343 = arith.addf %341, %342 : vector<4x32xf32>
    %344 = math.tanh %343 : vector<4x32xf32>
    %345 = arith.mulf %338, %344 : vector<4x32xf32>
    %c4_i32_73 = arith.constant 4 : i32
    %c3_i32_74 = arith.constant 3 : i32
    %346 = vector.broadcast %c4_i32_73 : i32 to vector<1x32xi32>
    %347 = vector.broadcast %c3_i32_74 : i32 to vector<1x32xi32>
    %348 = arith.select %154, %346, %347 : vector<1x32xi1>, vector<1x32xi32>
    %349 = vector.broadcast %348 : vector<1x32xi32> to vector<4x32xi32>
    %350 = vector.broadcast %150 : vector<4x1xi32> to vector<4x32xi32>
    %351 = arith.cmpi slt, %349, %350 : vector<4x32xi32>
    %cst_75 = arith.constant 0.000000e+00 : f32
    %352 = vector.broadcast %cst_75 : f32 to vector<4x32xf32>
    %353 = arith.select %351, %345, %352 : vector<4x32xi1>, vector<4x32xf32>
    %354 = arith.addf %315, %353 : vector<4x32xf32>
    %cst_76 = arith.constant -1.000000e+30 : f32
    %355 = vector.broadcast %cst_76 : f32 to vector<4x32xf32>
    %356 = arith.select %351, %345, %355 : vector<4x32xi1>, vector<4x32xf32>
    %357 = arith.maximumf %318, %356 : vector<4x32xf32>
    %358 = arith.select %351, %345, %319 : vector<4x32xi1>, vector<4x32xf32>
    %359 = arith.select %351, %343, %320 : vector<4x32xi1>, vector<4x32xf32>
    %360 = vector.extract_strided_slice %140 {offsets = [0, 5, 0], sizes = [4, 1, 128], strides = [1, 1, 1]} : vector<4x8x128xf32> to vector<4x1x128xf32>
    %361 = vector.shape_cast %360 : vector<4x1x128xf32> to vector<4x128xf32>
    %362 = vector.extract_strided_slice %140 {offsets = [0, 2, 0], sizes = [4, 1, 128], strides = [1, 1, 1]} : vector<4x8x128xf32> to vector<4x1x128xf32>
    %363 = vector.shape_cast %362 : vector<4x1x128xf32> to vector<4x128xf32>
    %364 = vector.shape_cast %159 : vector<1x128xi1> to vector<1x128xi1>
    %365 = vector.broadcast %364 : vector<1x128xi1> to vector<4x128xi1>
    %366 = arith.select %365, %361, %363 : vector<4x128xi1>, vector<4x128xf32>
    %cst_77 = arith.constant dense<0.000000e+00> : vector<4x128xf32>
    %367 = tpu.matmul %358, %160, %cst_77 {dimension_numbers = #tpu.dot_dimension_numbers<[1], [0], [0], [1], [0, 0, 1, 1], [], []>} : vector<4x32xf32>, vector<32x128xf32>, vector<4x128xf32> -> vector<4x128xf32>
    %368 = arith.addf %366, %367 : vector<4x128xf32>
    %369 = vector.extract_strided_slice %368 {offsets = [0, 0], sizes = [4, 96], strides = [1, 1]} : vector<4x128xf32> to vector<4x96xf32>
    %370 = arith.negf %369 : vector<4x96xf32>
    %371 = math.exp %370 : vector<4x96xf32>
    %cst_78 = arith.constant 1.000000e+00 : f32
    %372 = vector.broadcast %cst_78 : f32 to vector<4x96xf32>
    %373 = arith.addf %372, %371 : vector<4x96xf32>
    %374 = arith.divf %372, %373 : vector<4x96xf32>
    %375 = vector.extract_strided_slice %374 {offsets = [0, 0], sizes = [4, 32], strides = [1, 1]} : vector<4x96xf32> to vector<4x32xf32>
    %376 = vector.extract_strided_slice %374 {offsets = [0, 32], sizes = [4, 32], strides = [1, 1]} : vector<4x96xf32> to vector<4x32xf32>
    %377 = vector.extract_strided_slice %374 {offsets = [0, 64], sizes = [4, 32], strides = [1, 1]} : vector<4x96xf32> to vector<4x32xf32>
    %378 = vector.extract_strided_slice %368 {offsets = [0, 96], sizes = [4, 32], strides = [1, 1]} : vector<4x128xf32> to vector<4x32xf32>
    %379 = math.tanh %378 : vector<4x32xf32>
    %380 = arith.mulf %376, %359 : vector<4x32xf32>
    %381 = arith.mulf %375, %379 : vector<4x32xf32>
    %382 = arith.addf %380, %381 : vector<4x32xf32>
    %383 = math.tanh %382 : vector<4x32xf32>
    %384 = arith.mulf %377, %383 : vector<4x32xf32>
    %c5_i32_79 = arith.constant 5 : i32
    %c2_i32_80 = arith.constant 2 : i32
    %385 = vector.broadcast %c5_i32_79 : i32 to vector<1x32xi32>
    %386 = vector.broadcast %c2_i32_80 : i32 to vector<1x32xi32>
    %387 = arith.select %154, %385, %386 : vector<1x32xi1>, vector<1x32xi32>
    %388 = vector.broadcast %387 : vector<1x32xi32> to vector<4x32xi32>
    %389 = vector.broadcast %150 : vector<4x1xi32> to vector<4x32xi32>
    %390 = arith.cmpi slt, %388, %389 : vector<4x32xi32>
    %cst_81 = arith.constant 0.000000e+00 : f32
    %391 = vector.broadcast %cst_81 : f32 to vector<4x32xf32>
    %392 = arith.select %390, %384, %391 : vector<4x32xi1>, vector<4x32xf32>
    %393 = arith.addf %354, %392 : vector<4x32xf32>
    %cst_82 = arith.constant -1.000000e+30 : f32
    %394 = vector.broadcast %cst_82 : f32 to vector<4x32xf32>
    %395 = arith.select %390, %384, %394 : vector<4x32xi1>, vector<4x32xf32>
    %396 = arith.maximumf %357, %395 : vector<4x32xf32>
    %397 = arith.select %390, %384, %358 : vector<4x32xi1>, vector<4x32xf32>
    %398 = arith.select %390, %382, %359 : vector<4x32xi1>, vector<4x32xf32>
    %399 = vector.extract_strided_slice %140 {offsets = [0, 6, 0], sizes = [4, 1, 128], strides = [1, 1, 1]} : vector<4x8x128xf32> to vector<4x1x128xf32>
    %400 = vector.shape_cast %399 : vector<4x1x128xf32> to vector<4x128xf32>
    %401 = vector.extract_strided_slice %140 {offsets = [0, 1, 0], sizes = [4, 1, 128], strides = [1, 1, 1]} : vector<4x8x128xf32> to vector<4x1x128xf32>
    %402 = vector.shape_cast %401 : vector<4x1x128xf32> to vector<4x128xf32>
    %403 = vector.shape_cast %159 : vector<1x128xi1> to vector<1x128xi1>
    %404 = vector.broadcast %403 : vector<1x128xi1> to vector<4x128xi1>
    %405 = arith.select %404, %400, %402 : vector<4x128xi1>, vector<4x128xf32>
    %cst_83 = arith.constant dense<0.000000e+00> : vector<4x128xf32>
    %406 = tpu.matmul %397, %160, %cst_83 {dimension_numbers = #tpu.dot_dimension_numbers<[1], [0], [0], [1], [0, 0, 1, 1], [], []>} : vector<4x32xf32>, vector<32x128xf32>, vector<4x128xf32> -> vector<4x128xf32>
    %407 = arith.addf %405, %406 : vector<4x128xf32>
    %408 = vector.extract_strided_slice %407 {offsets = [0, 0], sizes = [4, 96], strides = [1, 1]} : vector<4x128xf32> to vector<4x96xf32>
    %409 = arith.negf %408 : vector<4x96xf32>
    %410 = math.exp %409 : vector<4x96xf32>
    %cst_84 = arith.constant 1.000000e+00 : f32
    %411 = vector.broadcast %cst_84 : f32 to vector<4x96xf32>
    %412 = arith.addf %411, %410 : vector<4x96xf32>
    %413 = arith.divf %411, %412 : vector<4x96xf32>
    %414 = vector.extract_strided_slice %413 {offsets = [0, 0], sizes = [4, 32], strides = [1, 1]} : vector<4x96xf32> to vector<4x32xf32>
    %415 = vector.extract_strided_slice %413 {offsets = [0, 32], sizes = [4, 32], strides = [1, 1]} : vector<4x96xf32> to vector<4x32xf32>
    %416 = vector.extract_strided_slice %413 {offsets = [0, 64], sizes = [4, 32], strides = [1, 1]} : vector<4x96xf32> to vector<4x32xf32>
    %417 = vector.extract_strided_slice %407 {offsets = [0, 96], sizes = [4, 32], strides = [1, 1]} : vector<4x128xf32> to vector<4x32xf32>
    %418 = math.tanh %417 : vector<4x32xf32>
    %419 = arith.mulf %415, %398 : vector<4x32xf32>
    %420 = arith.mulf %414, %418 : vector<4x32xf32>
    %421 = arith.addf %419, %420 : vector<4x32xf32>
    %422 = math.tanh %421 : vector<4x32xf32>
    %423 = arith.mulf %416, %422 : vector<4x32xf32>
    %c6_i32_85 = arith.constant 6 : i32
    %c1_i32_86 = arith.constant 1 : i32
    %424 = vector.broadcast %c6_i32_85 : i32 to vector<1x32xi32>
    %425 = vector.broadcast %c1_i32_86 : i32 to vector<1x32xi32>
    %426 = arith.select %154, %424, %425 : vector<1x32xi1>, vector<1x32xi32>
    %427 = vector.broadcast %426 : vector<1x32xi32> to vector<4x32xi32>
    %428 = vector.broadcast %150 : vector<4x1xi32> to vector<4x32xi32>
    %429 = arith.cmpi slt, %427, %428 : vector<4x32xi32>
    %cst_87 = arith.constant 0.000000e+00 : f32
    %430 = vector.broadcast %cst_87 : f32 to vector<4x32xf32>
    %431 = arith.select %429, %423, %430 : vector<4x32xi1>, vector<4x32xf32>
    %432 = arith.addf %393, %431 : vector<4x32xf32>
    %cst_88 = arith.constant -1.000000e+30 : f32
    %433 = vector.broadcast %cst_88 : f32 to vector<4x32xf32>
    %434 = arith.select %429, %423, %433 : vector<4x32xi1>, vector<4x32xf32>
    %435 = arith.maximumf %396, %434 : vector<4x32xf32>
    %436 = arith.select %429, %423, %397 : vector<4x32xi1>, vector<4x32xf32>
    %437 = arith.select %429, %421, %398 : vector<4x32xi1>, vector<4x32xf32>
    %438 = vector.extract_strided_slice %140 {offsets = [0, 7, 0], sizes = [4, 1, 128], strides = [1, 1, 1]} : vector<4x8x128xf32> to vector<4x1x128xf32>
    %439 = vector.shape_cast %438 : vector<4x1x128xf32> to vector<4x128xf32>
    %440 = vector.extract_strided_slice %140 {offsets = [0, 0, 0], sizes = [4, 1, 128], strides = [1, 1, 1]} : vector<4x8x128xf32> to vector<4x1x128xf32>
    %441 = vector.shape_cast %440 : vector<4x1x128xf32> to vector<4x128xf32>
    %442 = vector.shape_cast %159 : vector<1x128xi1> to vector<1x128xi1>
    %443 = vector.broadcast %442 : vector<1x128xi1> to vector<4x128xi1>
    %444 = arith.select %443, %439, %441 : vector<4x128xi1>, vector<4x128xf32>
    %cst_89 = arith.constant dense<0.000000e+00> : vector<4x128xf32>
    %445 = tpu.matmul %436, %160, %cst_89 {dimension_numbers = #tpu.dot_dimension_numbers<[1], [0], [0], [1], [0, 0, 1, 1], [], []>} : vector<4x32xf32>, vector<32x128xf32>, vector<4x128xf32> -> vector<4x128xf32>
    %446 = arith.addf %444, %445 : vector<4x128xf32>
    %447 = vector.extract_strided_slice %446 {offsets = [0, 0], sizes = [4, 96], strides = [1, 1]} : vector<4x128xf32> to vector<4x96xf32>
    %448 = arith.negf %447 : vector<4x96xf32>
    %449 = math.exp %448 : vector<4x96xf32>
    %cst_90 = arith.constant 1.000000e+00 : f32
    %450 = vector.broadcast %cst_90 : f32 to vector<4x96xf32>
    %451 = arith.addf %450, %449 : vector<4x96xf32>
    %452 = arith.divf %450, %451 : vector<4x96xf32>
    %453 = vector.extract_strided_slice %452 {offsets = [0, 0], sizes = [4, 32], strides = [1, 1]} : vector<4x96xf32> to vector<4x32xf32>
    %454 = vector.extract_strided_slice %452 {offsets = [0, 32], sizes = [4, 32], strides = [1, 1]} : vector<4x96xf32> to vector<4x32xf32>
    %455 = vector.extract_strided_slice %452 {offsets = [0, 64], sizes = [4, 32], strides = [1, 1]} : vector<4x96xf32> to vector<4x32xf32>
    %456 = vector.extract_strided_slice %446 {offsets = [0, 96], sizes = [4, 32], strides = [1, 1]} : vector<4x128xf32> to vector<4x32xf32>
    %457 = math.tanh %456 : vector<4x32xf32>
    %458 = arith.mulf %454, %437 : vector<4x32xf32>
    %459 = arith.mulf %453, %457 : vector<4x32xf32>
    %460 = arith.addf %458, %459 : vector<4x32xf32>
    %461 = math.tanh %460 : vector<4x32xf32>
    %462 = arith.mulf %455, %461 : vector<4x32xf32>
    %c7_i32_91 = arith.constant 7 : i32
    %c0_i32_92 = arith.constant 0 : i32
    %463 = vector.broadcast %c7_i32_91 : i32 to vector<1x32xi32>
    %464 = vector.broadcast %c0_i32_92 : i32 to vector<1x32xi32>
    %465 = arith.select %154, %463, %464 : vector<1x32xi1>, vector<1x32xi32>
    %466 = vector.broadcast %465 : vector<1x32xi32> to vector<4x32xi32>
    %467 = vector.broadcast %150 : vector<4x1xi32> to vector<4x32xi32>
    %468 = arith.cmpi slt, %466, %467 : vector<4x32xi32>
    %cst_93 = arith.constant 0.000000e+00 : f32
    %469 = vector.broadcast %cst_93 : f32 to vector<4x32xf32>
    %470 = arith.select %468, %462, %469 : vector<4x32xi1>, vector<4x32xf32>
    %471 = arith.addf %432, %470 : vector<4x32xf32>
    %cst_94 = arith.constant -1.000000e+30 : f32
    %472 = vector.broadcast %cst_94 : f32 to vector<4x32xf32>
    %473 = arith.select %468, %462, %472 : vector<4x32xi1>, vector<4x32xf32>
    %474 = arith.maximumf %435, %473 : vector<4x32xf32>
    %475 = arith.maxsi %2, %3 : i32
    %476 = arith.maxsi %4, %5 : i32
    %477 = tpu.iota {dimensions = array<i32: 0>} : vector<4x1xi32>
    %c2_i32_95 = arith.constant 2 : i32
    %478 = vector.broadcast %c2_i32_95 : i32 to vector<4x1xi32>
    %479 = arith.cmpi slt, %477, %478 : vector<4x1xi32>
    %480 = vector.broadcast %475 : i32 to vector<4x1xi32>
    %481 = vector.broadcast %476 : i32 to vector<4x1xi32>
    %482 = arith.select %479, %480, %481 : vector<4x1xi1>, vector<4x1xi32>
    %483 = arith.sitofp %482 : vector<4x1xi32> to vector<4x1xf32>
    %484 = vector.broadcast %483 : vector<4x1xf32> to vector<4x32xf32>
    %485 = arith.divf %471, %484 : vector<4x32xf32>
    %486 = arith.cmpf olt, %151, %483 : vector<4x1xf32>
    %cst_96 = arith.constant 0.000000e+00 : f32
    %487 = vector.broadcast %cst_96 : f32 to vector<4x32xf32>
    %488 = arith.maximumf %474, %487 : vector<4x32xf32>
    %489 = vector.shape_cast %486 : vector<4x1xi1> to vector<4x1xi1>
    %490 = vector.broadcast %489 : vector<4x1xi1> to vector<4x32xi1>
    %491 = arith.select %490, %488, %474 : vector<4x32xi1>, vector<4x32xf32>
    %c0_97 = arith.constant 0 : index
    %c0_98 = arith.constant 0 : index
    %492 = vector.load %arg6[%c0_97, %c0_98] : memref<128x4xf32, #tpu.memory_space<vmem>>, vector<128x4xf32>
    %493 = vector.extract_strided_slice %485 {offsets = [0, 0], sizes = [2, 32], strides = [1, 1]} : vector<4x32xf32> to vector<2x32xf32>
    %494 = vector.extract_strided_slice %492 {offsets = [0, 0], sizes = [32, 4], strides = [1, 1]} : vector<128x4xf32> to vector<32x4xf32>
    %cst_99 = arith.constant dense<0.000000e+00> : vector<2x4xf32>
    %495 = tpu.matmul %493, %494, %cst_99 {dimension_numbers = #tpu.dot_dimension_numbers<[1], [0], [0], [1], [0, 0, 1, 1], [], []>} : vector<2x32xf32>, vector<32x4xf32>, vector<2x4xf32> -> vector<2x4xf32>
    %496 = vector.extract_strided_slice %491 {offsets = [0, 0], sizes = [2, 32], strides = [1, 1]} : vector<4x32xf32> to vector<2x32xf32>
    %497 = vector.extract_strided_slice %492 {offsets = [32, 0], sizes = [32, 4], strides = [1, 1]} : vector<128x4xf32> to vector<32x4xf32>
    %cst_100 = arith.constant dense<0.000000e+00> : vector<2x4xf32>
    %498 = tpu.matmul %496, %497, %cst_100 {dimension_numbers = #tpu.dot_dimension_numbers<[1], [0], [0], [1], [0, 0, 1, 1], [], []>} : vector<2x32xf32>, vector<32x4xf32>, vector<2x4xf32> -> vector<2x4xf32>
    %499 = arith.addf %495, %498 : vector<2x4xf32>
    %500 = vector.extract_strided_slice %485 {offsets = [2, 0], sizes = [2, 32], strides = [1, 1]} : vector<4x32xf32> to vector<2x32xf32>
    %501 = vector.extract_strided_slice %492 {offsets = [64, 0], sizes = [32, 4], strides = [1, 1]} : vector<128x4xf32> to vector<32x4xf32>
    %cst_101 = arith.constant dense<0.000000e+00> : vector<2x4xf32>
    %502 = tpu.matmul %500, %501, %cst_101 {dimension_numbers = #tpu.dot_dimension_numbers<[1], [0], [0], [1], [0, 0, 1, 1], [], []>} : vector<2x32xf32>, vector<32x4xf32>, vector<2x4xf32> -> vector<2x4xf32>
    %503 = arith.addf %499, %502 : vector<2x4xf32>
    %504 = vector.extract_strided_slice %491 {offsets = [2, 0], sizes = [2, 32], strides = [1, 1]} : vector<4x32xf32> to vector<2x32xf32>
    %505 = vector.extract_strided_slice %492 {offsets = [96, 0], sizes = [32, 4], strides = [1, 1]} : vector<128x4xf32> to vector<32x4xf32>
    %cst_102 = arith.constant dense<0.000000e+00> : vector<2x4xf32>
    %506 = tpu.matmul %504, %505, %cst_102 {dimension_numbers = #tpu.dot_dimension_numbers<[1], [0], [0], [1], [0, 0, 1, 1], [], []>} : vector<2x32xf32>, vector<32x4xf32>, vector<2x4xf32> -> vector<2x4xf32>
    %507 = arith.addf %503, %506 : vector<2x4xf32>
    %c0_103 = arith.constant 0 : index
    %c0_104 = arith.constant 0 : index
    %508 = vector.load %arg7[%c0_103, %c0_104] : memref<1x4xf32, #tpu.memory_space<vmem>>, vector<1x4xf32>
    %509 = vector.broadcast %508 : vector<1x4xf32> to vector<2x4xf32>
    %510 = arith.addf %507, %509 : vector<2x4xf32>
    %cst_105 = arith.constant dense<0xFF800000> : vector<2xf32>
    %511 = vector.multi_reduction <maximumf>, %510, %cst_105 [1] : vector<2x4xf32> to vector<2xf32>
    %cst_106 = arith.constant 0xFF800000 : f32
    %512 = vector.broadcast %cst_106 : f32 to vector<2xf32>
    %513 = arith.maximumf %512, %511 : vector<2xf32>
    %514 = vector.shape_cast %513 : vector<2xf32> to vector<2x1xf32>
    %515 = vector.broadcast %514 : vector<2x1xf32> to vector<2x4xf32>
    %516 = arith.subf %510, %515 : vector<2x4xf32>
    %517 = math.exp %516 : vector<2x4xf32>
    %cst_107 = arith.constant dense<0.000000e+00> : vector<2xf32>
    %518 = vector.multi_reduction <add>, %517, %cst_107 [1] : vector<2x4xf32> to vector<2xf32>
    %519 = vector.shape_cast %518 : vector<2xf32> to vector<2x1xf32>
    %520 = vector.broadcast %519 : vector<2x1xf32> to vector<2x4xf32>
    %521 = arith.divf %517, %520 : vector<2x4xf32>
    %c0_108 = arith.constant 0 : index
    %c0_109 = arith.constant 0 : index
    %522 = vector.load %arg8[%c0_108, %c0_109] : memref<2x4xf32, #tpu.memory_space<vmem>>, vector<2x4xf32>
    tpu.vector_store %arg8[%c0_108, %c0_109], %521 {strides = array<i32>} : memref<2x4xf32, #tpu.memory_space<vmem>>, vector<2x4xf32>,
    return
  }
  func.func @transform_0(%arg0: i32, %arg1: memref<8xi32, #tpu.memory_space<smem>>) -> (i32, i32, i32) {
    %c0_i32 = arith.constant 0 : i32
    %c0_i32_0 = arith.constant 0 : i32
    %c0_i32_1 = arith.constant 0 : i32
    %c0_i32_2 = arith.constant 0 : i32
    return %c0_i32, %c0_i32_0, %c0_i32_1 : i32, i32, i32
  }
  func.func @transform_1(%arg0: i32, %arg1: memref<8xi32, #tpu.memory_space<smem>>) -> (i32, i32) {
    %c0_i32 = arith.constant 0 : i32
    %c0_i32_0 = arith.constant 0 : i32
    %c0_i32_1 = arith.constant 0 : i32
    return %c0_i32, %c0_i32_0 : i32, i32
  }
  func.func @transform_2(%arg0: i32, %arg1: memref<8xi32, #tpu.memory_space<smem>>) -> (i32, i32) {
    %c0_i32 = arith.constant 0 : i32
    %c0_i32_0 = arith.constant 0 : i32
    %c0_i32_1 = arith.constant 0 : i32
    return %c0_i32, %c0_i32_0 : i32, i32
  }
  func.func @transform_3(%arg0: i32, %arg1: memref<8xi32, #tpu.memory_space<smem>>) -> (i32, i32) {
    %c0_i32 = arith.constant 0 : i32
    %c0_i32_0 = arith.constant 0 : i32
    %c0_i32_1 = arith.constant 0 : i32
    return %c0_i32, %c0_i32_0 : i32, i32
  }
  func.func @transform_4(%arg0: i32, %arg1: memref<8xi32, #tpu.memory_space<smem>>) -> (i32, i32) {
    %c0_i32 = arith.constant 0 : i32
    %c0_i32_0 = arith.constant 0 : i32
    %c0_i32_1 = arith.constant 0 : i32
    return %c0_i32, %c0_i32_0 : i32, i32
  }
  func.func @transform_5(%arg0: i32, %arg1: memref<8xi32, #tpu.memory_space<smem>>) -> (i32, i32) {
    %c0_i32 = arith.constant 0 : i32
    %c0_i32_0 = arith.constant 0 : i32
    %c0_i32_1 = arith.constant 0 : i32
    return %c0_i32, %c0_i32_0 : i32, i32
  }
  func.func @transform_6(%arg0: i32, %arg1: memref<8xi32, #tpu.memory_space<smem>>) -> (i32, i32) {
    %c0_i32 = arith.constant 0 : i32
    %c0_i32_0 = arith.constant 0 : i32
    %c0_i32_1 = arith.constant 0 : i32
    return %c0_i32, %c0_i32_0 : i32, i32
  }
}

</mosaic_0001>

<bundles_post_ra>
// kernel: fused_esim_pallas.1
= control target key start
LH: loop header
LB: loop body
LE: loop exit
PB: predicated region body
PF: predicated region fallthrough
CT: control target
= control target key end

     0   :  { %s1726_s27 = smov [#allocation3]   ;;  %s2269_s0 = inlined_call_operand.vmem [shape: s32[8], index: 0, kind: input, shape index: {}]   ;;  %s2270_s1 = inlined_call_operand.hbm [shape: f32[2,24,32], index: 1, kind: input, shape index: {}]   ;;  %s2271_s2 = inlined_call_operand.vmem [shape: f32[128,128], index: 2, kind: input, shape index: {}]   ;;  %s2272_s3 = inlined_call_operand.hbm [shape: f32[32,128], index: 3, kind: input, shape index: {}]   ;;  %s2273_s4 = inlined_call_operand.vmem [shape: f32[1,128], index: 4, kind: input, shape index: {}]   ;;  %s2274_s5 = inlined_call_operand.vmem [shape: f32[128,4], index: 5, kind: input, shape index: {}]   ;;  %s2275_s6 = inlined_call_operand.vmem [shape: f32[1,4], index: 6, kind: input, shape index: {}]   ;;  %s2276_s7 = inlined_call_operand.hbm [shape: f32[2,4], index: 7, kind: output, shape index: {}]  }
   0x1   :  { %s13_s26 = sshll.u32 %s2269_s0, 4  ;;  %s14_s26 = int_to_ptr.vmem [resolvable:$true] %s13_s26 }
   0x2   :  { %16 = dma.vmem_to_smem %s14_s26, 16, %s1726_s27, [#allocation2] }
   0x3   :  { %1718 = dma.done.wait [#allocation2], 16 }
   0x4   :  { %1719 = vsyncadd [#allocation2], 4294967280 }
   0x5   :  { %19 = sfence }
   0x6   :  { %20 = vsyncpa [#allocation5], 0 }
   0x7   :  { %21 = vsyncpa [#allocation8], 0 }
   0x8   :  { %22 = vsyncpa [#allocation6], 0  ;;  %s27_s30 = sshll.u32 %s2270_s1, 4  ;;  %s1727_s8 = smov [#allocation4]   ;;  %s28_s30 = int_to_ptr.hbm [resolvable:$true] %s27_s30 }
   0x9   :  { %s29_s9 = sshll.u32 %s1727_s8, 4  ;;  %s42_s0 = sshll.u32 %s2272_s3, 4  ;;  %s30_s9 = int_to_ptr.vmem [resolvable:$true] %s29_s9  ;;  %s43_s0 = int_to_ptr.hbm [resolvable:$true] %s42_s0 }
   0xa   :  { %s1728_s12 = smov 128   ;;  %s1729_s13 = smov 8  }
   0xb   :  { %35 = dma.hbm_to_vmem [thread:$0]  %s28_s30, 768, %s30_s9, [#allocation5], %s1728_s12, %s1728_s12, %s1729_s13  }
   0xc   :  { %s1730_s14 = smov [#allocation7]  }
   0xd   :  { %s44_s15 = sshll.u32 %s1730_s14, 4  ;;  %s45_s15 = int_to_ptr.vmem [resolvable:$true] %s44_s15 }
   0xe   :  { %50 = dma.hbm_to_vmem [thread:$0]  %s43_s0, 512, %s45_s15, [#allocation8], %s1728_s12, %s1728_s12, %s1729_s13  }
   0xf   :  { %1720 = dma.done.wait [#allocation5], 768  }
  0x10   :  { %1721 = vsyncadd [#allocation5], 4294966528 }
  0x11   :  { %1722 = dma.done.wait [#allocation8], 512  }
  0x12   :  { %1723 = vsyncadd [#allocation8], 4294966784  ;;  %v65_v0 = vlaneseq  ;;  %s1794_s1 = sld [smem:[#allocation3 + $0x6]]  ;;  %vm93_vm1 = vcmask 261120   ;;  %v1731_v9 = vmov -1e+15  }
  0x13   :  { %s1469_s16 = sld [smem:[#allocation3 + $0x4]]  ;;  %vm120_vm5 = vcmask 64512   ;;  %v352_v38 = vld [vmem:[%s2271_s2 + $0x38] sm:$0xff]  ;;  %v351_v39 = vld [vmem:[%s2271_s2 + $0x30] sm:$0xff]  ;;  %v350_v40 = vld [vmem:[%s2271_s2 + $0x28] sm:$0xff]  ;;  %vm558_vm10 = vcmask 1041409  }
  0x14   :  { %s1796_s17 = sld [smem:[#allocation3 + $0x2]]  ;;  %v1798_v1 = vshrl.u32 %v65_v0, 7  ;;  %v1822_v8 = vand.u32 127, %v65_v0  ;;  %v348_v43 = vld [vmem:[%s2271_s2 + $0x18] sm:$0xff]  ;;  %v347_v44 = vld [vmem:[%s2271_s2 + $0x10] sm:$0xff]  ;;  %v346_v45 = vld [vmem:[%s2271_s2 + $0x8] sm:$0xff] }
  0x15   :  { %s73_s3 = sld [smem:[#allocation3]]  ;;  %v349_v46 = vld [vmem:[%s2271_s2 + $0x20] sm:$0xff]  ;;  %vm561_vm11 = vcmask 1042434   ;;  %vm564_vm12 = vcmask 1043459   ;;  %vm537_vm14 = vcmask 1040384   ;;  %vm539_vm15 = vcmask 1041408  }
  0x16   :  { %s1479_s20 = sld [smem:[#allocation3 + $0x5]]  ;;  %v345_v47 = vld [vmem:[%s2271_s2] sm:$0xff]  ;;  %s1735_s13 = smov 96  }
  0x17   :  { %s1834_s21 = sld [smem:[#allocation3 + $0x7]]  ;;  %s1736_s14 = smov 64  }
  0x18   :  { %v1801_v2 = vstv %s1794_s1  ;;  %s1478_s22 = sld [smem:[#allocation3 + $0x1]] }
  0x19   :  { %vm85_vm0 = vcmp.lt.s32.totalorder %v1798_v1, %v1801_v2  ;;  %s77_s18 = scalar_lea.vmem [#allocation4], %s1469_s16  ;;  %vm91_vm3 = vcmp.lt.s32.totalorder %v1822_v8, %v1801_v2  ;;  %s1836_s23 = sld [smem:[#allocation3 + $0x3]] }
  0x1a   :  { %v78_v3 = vld [vmem:[%s77_s18] sm:$0xff]  ;;  %v1806_v4 = vstv %s1796_s17  ;;  %v92_v10 = vsel %vm91_vm3, 1.0, %v1731_v9 }
  0x1b   :  { %v1808_v5 = vsel %vm85_vm0, %v78_v3, 0.0  ;;  %vm80_vm2 = vcmp.lt.s32.totalorder %v1798_v1, %v1806_v4  ;;  %1474 = vmatpush.msk.msra.mxu2 %vm85_vm0, %v78_v3  ;;  %s75_s19 = scalar_lea.vmem [#allocation4], %s73_s3  ;;  %vm89_vm4 = vcmp.lt.s32.totalorder %v1822_v8, %v1806_v4  ;;  %vm541_vm0 = vcmask 1042432  }
  0x1c   :  { %1470 = vmatpush.xpose.msk.msra.mxu0 %vm93_vm1, %v1808_v5  ;;  %v76_v6 = vld [vmem:[%s75_s19] sm:$0xff]  ;;  %v90_v13 = vsel %vm89_vm4, 1.0, %v1731_v9  ;;  %s1463_s24 = scalar_lea.vmem [#allocation4], %s1479_s20  ;;  %s1448_s19 = sshll.u32 %s2276_s7, 4  ;;  %s1449_s19 = int_to_ptr.hbm [resolvable:$true] %s1448_s19 }
  0x1d   :  { %v1814_v7 = vsel %vm80_vm2, %v76_v6, 0.0  ;;  %1476 = vmatpush.msk.msra.mxu3 %vm80_vm2, %v76_v6  ;;  %v1481_v28 = vld [vmem:[%s1463_s24 + $0x18] sm:$0xff]  ;;  %v1839_v29 = vstv %s1834_s21  ;;  %p1270_p1 = scmp.gt.s32.totalorder %s1794_s1, %s1834_s21 }
  0x1e   :  { %1472 = vmatpush.xpose.msk.msra.mxu1 %vm93_vm1, %v1814_v7  ;;  %vm223_vm6 = vcmp.lt.s32.totalorder %v1798_v1, %v1839_v29  ;;  %s1461_s25 = scalar_lea.vmem [#allocation4], %s1478_s22  ;;  %vm229_vm8 = vcmp.lt.s32.totalorder %v1822_v8, %v1839_v29 }
  0x1f   :  { %1471 = vmatmul.msk.f32.vlgmr.msra.gmra.mxu0 %vm93_vm1, %v1814_v7  ;;  %v1843_v30 = vsel %vm223_vm6, %v1481_v28, 0.0  ;;  %v1848_v31 = vstv %s1836_s23  ;;  %v1480_v32 = vld [vmem:[%s1461_s25 + $0x18] sm:$0xff]  ;;  %v230_v49 = vsel %vm229_vm8, 1.0, %v1731_v9  ;;  %p1268_p0 = scmp.gt.s32.totalorder %s1796_s17, %s1836_s23  ;;  %s2282_s1 = smov (!%p1270_p1, %s1794_s1), %s1834_s21 }
  0x20   :  { %1486 = vmatpush.msk.msrb.mxu0 %vm223_vm6, %v1481_v28  ;;  %1482 = vmatpush.xpose.msk.msrb.mxu2 %vm93_vm1, %v1843_v30  ;;  %vm218_vm7 = vcmp.lt.s32.totalorder %v1798_v1, %v1848_v31  ;;  %vm227_vm9 = vcmp.lt.s32.totalorder %v1822_v8, %v1848_v31  ;;  %v548_v28 = vld [vmem:[#allocation7 + $0x8] sm:$0xff]  ;;  %vm544_vm6 = vcmp.lt.s32.totalorder %v1822_v8, 16 }
  0x21   :  { %1473 = vmatmul.msk.f32.vlgmr.msra.gmra.mxu1 %vm93_vm1, %v1808_v5  ;;  %v1852_v33 = vsel %vm218_vm7, %v1480_v32, 0.0  ;;  %v228_v54 = vsel %vm227_vm9, 1.0, %v1731_v9  ;;  %s2280_s17 = smov (!%p1268_p0, %s1796_s17), %s1836_s23 }
  0x22   :  { %1488 = vmatpush.msk.msrb.mxu1 %vm218_vm7, %v1480_v32  ;;  %1484 = vmatpush.xpose.msk.msrb.mxu3 %vm93_vm1, %v1852_v33  ;;  %v547_v32 = vld [vmem:[#allocation7] sm:$0xff] }
  0x9c   :  { %v117_v11 = vpop.f32.mrf.mxu0 }
  0x9d   :  { %v118_v12 = vadd.f32 %v117_v11, %v92_v10  ;;  %v430_v10 = vld [vmem:[%s2271_s2 + $0x58] sm:$0xff]  ;;  %v429_v11 = vld [vmem:[%s2271_s2 + $0x50] sm:$0xff] }
  0x9e   :  { %v149_v14 = vpop.f32.mrf.mxu1  ;;  %455 = vmatpush.msra.mxu0 %v430_v10 }
  0x9f   :  { %v121_v15 = vsel %vm120_vm5, %v118_v12, -inf  ;;  %v150_v16 = vadd.f32 %v149_v14, %v90_v13  ;;  %v427_v13 = vld [vmem:[%s2271_s2 + $0x40] sm:$0xff]  ;;  %v483_v14 = vld [vmem:[%s2271_s2 + $0x78] sm:$0xff] }
  0xa0   :  { %122 = vmax.xlane.f32.xlu0 %v121_v15  ;;  %456 = vmatpush.msra.mxu0 %v429_v11  ;;  %v482_v15 = vld [vmem:[%s2271_s2 + $0x70] sm:$0xff] }
  0xa1   :  { %v152_v17 = vsel %vm120_vm5, %v150_v16, -inf  ;;  %508 = vmatpush.msra.mxu1 %v483_v14 }
  0xa3   :  { %509 = vmatpush.msra.mxu1 %v482_v15 }
  0xa8   :  { %153 = vmax.xlane.f32.xlu0 %v152_v17  ;;  %v480_v17 = vld [vmem:[%s2271_s2 + $0x60] sm:$0xff] }
 0x113   :  { %v123_v18 = vpop.xlane.xlu0 %122 }
 0x114   :  { %v124_v19 = vsub.f32 %v118_v12, %v123_v18  ;;  %v428_v12 = vld [vmem:[%s2271_s2 + $0x48] sm:$0xff] }
 0x115   :  { %457 = vmatpush.msra.mxu0 %v428_v12  ;;  %v550_v18 = vld [vmem:[#allocation7 + $0x18] sm:$0xff] }
 0x116   :  { %v125_v20 = vmul.f32 1.442695, %v124_v19 }
 0x117   :  { %458 = vmatpush.msra.mxu0 %v427_v13 }
 0x118   :  { %1548 = vpow2.f32 %v125_v20 }
 0x11b   :  { %v154_v21 = vpop.xlane.xlu0 %153 }
 0x11c   :  { %v155_v22 = vsub.f32 %v150_v16, %v154_v21  ;;  %v481_v16 = vld [vmem:[%s2271_s2 + $0x68] sm:$0xff] }
 0x11d   :  { %510 = vmatpush.msra.mxu1 %v481_v16 }
 0x11e   :  { %v1549_v23 = vpop.eup %1548  ;;  %v156_v24 = vmul.f32 1.442695, %v155_v22 }
 0x11f   :  { %v127_v25 = vsel %vm120_vm5, %v1549_v23, 0.0  ;;  %511 = vmatpush.msra.mxu1 %v480_v17 }
 0x120   :  { %1550 = vpow2.f32 %v156_v24  ;;  %128 = vadd.xlane.f32.xlu1 %v127_v25 }
 0x126   :  { %v1551_v26 = vpop.eup %1550 }
 0x127   :  { %v158_v27 = vsel %vm120_vm5, %v1551_v26, 0.0 }
 0x128   :  { %159 = vadd.xlane.f32.xlu1 %v158_v27  ;;  %v549_v27 = vld [vmem:[#allocation7 + $0x10] sm:$0xff] }
 0x193   :  { %v129_v34 = vpop.xlane.xlu1 %128 }
 0x194   :  { %1552 = vrcp.f32 %v129_v34 }
 0x19a   :  { %v1553_v35 = vpop.eup %1552 }
 0x19b   :  { %v160_v36 = vpop.xlane.xlu1 %159  ;;  %v131_v37 = vmul.f32 %v1553_v35, %v1549_v23 }
 0x19c   :  { %1554 = vrcp.f32 %v160_v36 }
 0x19d   :  { %1475 = vmatmul.msk.f32.vlgmr.msra.gmra.mxu2 %vm120_vm5, %v131_v37 }
 0x19e   :  { %377 = vmatpush.msra.mxu2 %v352_v38 }
 0x1a0   :  { %378 = vmatpush.msra.mxu2 %v351_v39 }
 0x1a2   :  { %v1555_v41 = vpop.eup %1554  ;;  %379 = vmatpush.msra.mxu2 %v350_v40  ;;  %v1732_v40 = vmov 0.0  }
 0x1a3   :  { %v162_v42 = vmul.f32 %v1555_v41, %v1551_v26 }
 0x1a4   :  { %380 = vmatpush.msra.mxu2 %v349_v46 }
 0x1a5   :  { %1477 = vmatmul.msk.f32.vlgmr.msra.gmra.mxu3 %vm120_vm5, %v162_v42  ;;  %1483 = vmatmul.msk.f32.vlgmr.msrb.gmra.mxu2 %vm93_vm1, %v1852_v33 }
 0x1a6   :  { %406 = vmatpush.msra.mxu3 %v348_v43  ;;  %591 = vmatpush.msrb.mxu2 %v550_v18 }
 0x1a8   :  { %407 = vmatpush.msra.mxu3 %v347_v44  ;;  %592 = vmatpush.msrb.mxu2 %v549_v27 }
 0x1aa   :  { %408 = vmatpush.msra.mxu3 %v346_v45  ;;  %593 = vmatpush.msrb.mxu2 %v548_v28 }
 0x1ac   :  { %409 = vmatpush.msra.mxu3 %v345_v47  ;;  %594 = vmatpush.msrb.mxu2 %v547_v32 }
 0x1ad   :  { %1485 = vmatmul.msk.f32.vlgmr.msrb.gmra.mxu3 %vm93_vm1, %v1843_v30 }
 0x1ae   :  { %686 = vmatpush.msrb.mxu3 %v550_v18 }
 0x1b0   :  { %687 = vmatpush.msrb.mxu3 %v549_v27 }
 0x1b2   :  { %688 = vmatpush.msrb.mxu3 %v548_v28 }
 0x1b4   :  { %689 = vmatpush.msrb.mxu3 %v547_v32 }
 0x1b5   :  { %1494 = vmatmul.msk.f32.vlgmr.msra.gmra.mxu3 %vm93_vm1, %v1814_v7 }
 0x1b6   :  { %1044 = vmatpush.msra.mxu3 %v550_v18 }
 0x1b8   :  { %1045 = vmatpush.msra.mxu3 %v549_v27 }
 0x1ba   :  { %1046 = vmatpush.msra.mxu3 %v548_v28 }
 0x1bc   :  { %1047 = vmatpush.msra.mxu3 %v547_v32 }
 0x1bd   :  { %1495 = vmatmul.msk.f32.gmra.mxu3 %vm93_vm1, %v1852_v33 }
 0x1c5   :  { %1496 = vmatmul.msk.f32.gmra.mxu3 %vm93_vm1, %v1808_v5 }
 0x1cd   :  { %1497 = vmatmul.msk.f32.gmra.mxu3 %vm93_vm1, %v1843_v30 }
 0x220   :  { %v183_v48 = vpop.f32.mrf.mxu2 }
 0x221   :  { %1490 = vmatmul.msk.f32.vlgmr.msra.gmra.mxu2 %vm93_vm1, %v183_v48  ;;  %v423_v24 = vsub.f32 %v1814_v7, %v183_v48  ;;  %v476_v26 = vmul.f32 %v183_v48, %v1814_v7 }
 0x222   :  { %962 = vmatpush.msra.mxu2 %v550_v18 }
 0x224   :  { %963 = vmatpush.msra.mxu2 %v549_v27 }
 0x226   :  { %964 = vmatpush.msra.mxu2 %v548_v28 }
 0x228   :  { %v1898_v50 = vpop.f32.mrf.mxu3  ;;  %v254_v51 = vpop.f32.mrf.mxu2  ;;  %965 = vmatpush.msra.mxu2 %v547_v32 }
 0x229   :  { %v255_v52 = vadd.f32 %v254_v51, %v230_v49  ;;  %v425_v36 = vsub.f32 %v1808_v5, %v1898_v50  ;;  %v478_v37 = vmul.f32 %v1898_v50, %v1808_v5 }
 0x22b   :  { %v257_v53 = vsel %vm120_vm5, %v255_v52, -inf }
 0x22c   :  { %258 = vmax.xlane.f32.xlu2 %v257_v53 }
 0x230   :  { %v285_v55 = vpop.f32.mrf.mxu3 }
 0x231   :  { %v286_v56 = vadd.f32 %v285_v55, %v228_v54 }
 0x233   :  { %v288_v57 = vsel %vm120_vm5, %v286_v56, -inf }
 0x234   :  { %289 = vmax.xlane.f32.xlu2 %v288_v57 }
 0x238   :  { %v411_v5 = vpop.f32.mrf.mxu3 }
 0x240   :  { %v414_v44 = vpop.f32.mrf.mxu3 }
 0x248   :  { %v417_v54 = vpop.f32.mrf.mxu3 }
 0x29f   :  { %v259_v58 = vpop.xlane.xlu2 %258 }
 0x2a0   :  { %v260_v59 = vsub.f32 %v255_v52, %v259_v58 }
 0x2a2   :  { %v261_v60 = vmul.f32 1.442695, %v260_v59 }
 0x2a4   :  { %1556 = vpow2.f32 %v261_v60  ;;  %v382_v42 = vpop.f32.mrf.mxu2 }
 0x2a5   :  { %v412_v45 = vadd.f32 %v411_v5, %v382_v42 }
 0x2a7   :  { %v290_v61 = vpop.xlane.xlu2 %289 }
 0x2a8   :  { %v291_v62 = vsub.f32 %v286_v56, %v290_v61 }
 0x2aa   :  { %v1557_v63 = vpop.eup %1556  ;;  %v292_v0 = vmul.f32 1.442695, %v291_v62 }
 0x2ab   :  { %v263_v3 = vsel %vm120_vm5, %v1557_v63, 0.0 }
 0x2ac   :  { %1558 = vpow2.f32 %v292_v0  ;;  %264 = vadd.xlane.f32.xlu0 %v263_v3 }
 0x2b2   :  { %v1559_v6 = vpop.eup %1558 }
 0x2b3   :  { %v294_v9 = vsel %vm120_vm5, %v1559_v6, 0.0 }
 0x2b4   :  { %295 = vadd.xlane.f32.xlu1 %v294_v9 }
 0x31f   :  { %v265_v19 = vpop.xlane.xlu0 %264 }
 0x320   :  { %1560 = vrcp.f32 %v265_v19 }
 0x326   :  { %v1561_v20 = vpop.eup %1560 }
 0x327   :  { %v296_v21 = vpop.xlane.xlu1 %295  ;;  %v267_v22 = vmul.f32 %v1561_v20, %v1557_v63 }
 0x328   :  { %1562 = vrcp.f32 %v296_v21 }
 0x329   :  { %1487 = vmatmul.msk.f32.vlgmr.msrb.gmra.mxu0 %vm120_vm5, %v267_v22  ;;  %v420_v22 = vpop.f32.mrf.mxu3 }
 0x32a   :  { %783 = vmatpush.msrb.mxu0 %v550_v18 }
 0x32c   :  { %784 = vmatpush.msrb.mxu0 %v549_v27 }
 0x32e   :  { %v1563_v23 = vpop.eup %1562  ;;  %785 = vmatpush.msrb.mxu0 %v548_v28 }
 0x32f   :  { %v298_v25 = vmul.f32 %v1563_v23, %v1559_v6 }
 0x330   :  { %786 = vmatpush.msrb.mxu0 %v547_v32 }
 0x331   :  { %1489 = vmatmul.msk.f32.vlgmr.msrb.gmra.mxu1 %vm120_vm5, %v298_v25  ;;  %1498 = vmatmul.msk.f32.vlgmr.msra.gmra.mxu0 %vm93_vm1, %v423_v24  ;;  %v545_v25 = vand.u32 16, %v1822_v8 }
 0x332   :  { %880 = vmatpush.msrb.mxu1 %v550_v18  ;;  %1126 = vmatpush.msra.mxu0 %v550_v18 }
 0x333   :  { %vm1973_vm13 = vcmp.eq.s32.totalorder %v545_v25, 0  ;;  %v538_v25 = vsel %vm537_vm14, %v1806_v4, %v1848_v31 }
 0x334   :  { %881 = vmatpush.msrb.mxu1 %v549_v27  ;;  %1127 = vmatpush.msra.mxu0 %v549_v27 }
 0x336   :  { %882 = vmatpush.msrb.mxu1 %v548_v28  ;;  %1128 = vmatpush.msra.mxu0 %v548_v28 }
 0x338   :  { %883 = vmatpush.msrb.mxu1 %v547_v32  ;;  %1129 = vmatpush.msra.mxu0 %v547_v32 }
 0x339   :  { %1502 = vmatmul.msk.f32.vlgmr.msra.gmra.mxu1 %vm93_vm1, %v476_v26 }
 0x33a   :  { %1208 = vmatpush.msra.mxu1 %v550_v18 }
 0x33c   :  { %1209 = vmatpush.msra.mxu1 %v549_v27 }
 0x33e   :  { %1210 = vmatpush.msra.mxu1 %v548_v28 }
 0x340   :  { %1211 = vmatpush.msra.mxu1 %v547_v32 }
 0x3a6   :  { %v319_v7 = vpop.f32.mrf.mxu0 }
 0x3a7   :  { %v424_v34 = vsub.f32 %v1852_v33, %v319_v7  ;;  %v477_v35 = vmul.f32 %v319_v7, %v1852_v33  ;;  %1491 = vmatmul.msk.f32.gmra.mxu2 %vm93_vm1, %v319_v7 }
 0x3a9   :  { %1499 = vmatmul.msk.f32.gmra.mxu0 %vm93_vm1, %v424_v34  ;;  %1503 = vmatmul.msk.f32.gmra.mxu1 %vm93_vm1, %v477_v35 }
 0x3ae   :  { %v342_v33 = vpop.f32.mrf.mxu1  ;;  %v460_v41 = vpop.f32.mrf.mxu0 }
 0x3af   :  { %1492 = vmatmul.msk.f32.gmra.mxu2 %vm93_vm1, %v1898_v50  ;;  %v426_v38 = vsub.f32 %v1843_v30, %v342_v33  ;;  %v479_v39 = vmul.f32 %v342_v33, %v1843_v30  ;;  %v472_v46 = vadd.f32 %v460_v41, %v412_v45  ;;  %v1546_v30 = vld [vmem:[%s2273_s4] ss:$0 sm:$0xff]  ;;  %s1733_s4 = smov 32  }
 0x3b1   :  { %1500 = vmatmul.msk.f32.gmra.mxu0 %vm93_vm1, %v425_v36  ;;  %1504 = vmatmul.msk.f32.gmra.mxu1 %vm93_vm1, %v478_v37 }
 0x3b6   :  { %v513_v43 = vpop.f32.mrf.mxu1 }
 0x3b7   :  { %1493 = vmatmul.msk.f32.gmra.mxu2 %vm93_vm1, %v342_v33  ;;  %v525_v48 = vadd.f32 %v513_v43, %v472_v46 }
 0x3b9   :  { %1501 = vmatmul.msk.f32.gmra.mxu0 %vm93_vm1, %v426_v38  ;;  %1505 = vmatmul.msk.f32.gmra.mxu1 %vm93_vm1, %v479_v39  ;;  %v533_v52 = vadd.f32 %v1546_v30, %v525_v48 }
 0x3bb   :  { %v655_v57 = vrot.slane %v533_v52, 1  ;;  %v662_v60 = vrot.slane %v533_v52, 6  ;;  %v752_v61 = vrot.slane %v533_v52, 2  ;;  %v759_v0 = vrot.slane %v533_v52, 5 }
 0x3bc   :  { %v849_v3 = vrot.slane %v533_v52, 3  ;;  %v856_v14 = vrot.slane %v533_v52, 4  ;;  %v567_v46 = vrot.slane %v533_v52, 7 }
 0x3bf   :  { %595 = vmatmul.f32.vlgmr.msrb.gmra.mxu2 %v1732_v40 }
 0x426   :  { %v463_v47 = vpop.f32.mrf.mxu0  ;;  %v516_v49 = vpop.f32.mrf.mxu1 }
 0x42a   :  { %v385_v50 = vpop.f32.mrf.mxu2 }
 0x42b   :  { %v415_v51 = vadd.f32 %v414_v44, %v385_v50 }
 0x42d   :  { %v473_v53 = vadd.f32 %v463_v47, %v415_v51 }
 0x42e   :  { %v466_v58 = vpop.f32.mrf.mxu0  ;;  %v519_v6 = vpop.f32.mrf.mxu1 }
 0x42f   :  { %v526_v55 = vadd.f32 %v516_v49, %v473_v53 }
 0x431   :  { %v534_v56 = vadd.f32 %v1546_v30, %v526_v55 }
 0x432   :  { %v388_v59 = vpop.f32.mrf.mxu2 }
 0x433   :  { %v418_v62 = vadd.f32 %v417_v54, %v388_v59  ;;  %v656_v63 = vsel %vm558_vm10, %v534_v56, %v655_v57  ;;  %v663_v9 = vrot.slane %v534_v56, 5  ;;  %v753_v10 = vrot.slane %v534_v56, 1 }
 0x434   :  { %v760_v11 = vrot.slane %v534_v56, 4  ;;  %v850_v12 = vrot.slane %v534_v56, 2  ;;  %v857_v15 = vrot.slane %v534_v56, 3  ;;  %v557_v27 = vrot.slane %v534_v56, 7 }
 0x435   :  { %v474_v13 = vadd.f32 %v466_v58, %v418_v62  ;;  %v664_v16 = vsel %vm558_vm10, %v663_v9, %v662_v60  ;;  %v754_v17 = vsel %vm558_vm10, %v753_v10, %v752_v61  ;;  %v568_v28 = vrot.slane %v534_v56, 6 }
 0x436   :  { %v761_v18 = vsel %vm558_vm10, %v760_v11, %v759_v0  ;;  %v851_v19 = vsel %vm558_vm10, %v850_v12, %v849_v3  ;;  %v858_v21 = vsel %vm558_vm10, %v857_v15, %v856_v14  ;;  %v469_v7 = vpop.f32.mrf.mxu0  ;;  %v522_v5 = vpop.f32.mrf.mxu1  ;;  %v559_v49 = vsel %vm558_vm10, %v557_v27, %v533_v52 }
 0x437   :  { %v527_v20 = vadd.f32 %v519_v6, %v474_v13  ;;  %v569_v50 = vsel %vm558_vm10, %v568_v28, %v567_v46 }
 0x439   :  { %v535_v23 = vadd.f32 %v1546_v30, %v527_v20 }
 0x43a   :  { %v391_v24 = vpop.f32.mrf.mxu2 }
 0x43b   :  { %v421_v26 = vadd.f32 %v420_v22, %v391_v24  ;;  %v657_v32 = vrot.slane %v535_v23, 7  ;;  %v665_v34 = vrot.slane %v535_v23, 4  ;;  %v755_v35 = vsel %vm561_vm11, %v535_v23, %v754_v17 }
 0x43c   :  { %v762_v36 = vrot.slane %v535_v23, 3  ;;  %v852_v37 = vrot.slane %v535_v23, 1  ;;  %v560_v38 = vrot.slane %v535_v23, 6  ;;  %v570_v39 = vrot.slane %v535_v23, 5 }
 0x43d   :  { %v475_v33 = vadd.f32 %v469_v7, %v421_v26  ;;  %v658_v40 = vsel %vm561_vm11, %v657_v32, %v656_v63  ;;  %v666_v41 = vsel %vm561_vm11, %v665_v34, %v664_v16  ;;  %v859_v44 = vrot.slane %v535_v23, 2 }
 0x43e   :  { %v763_v42 = vsel %vm561_vm11, %v762_v36, %v761_v18  ;;  %v853_v43 = vsel %vm561_vm11, %v852_v37, %v851_v19  ;;  %v562_v53 = vsel %vm561_vm11, %v560_v38, %v559_v49  ;;  %v571_v54 = vsel %vm561_vm11, %v570_v39, %v569_v50 }
 0x43f   :  { %v528_v45 = vadd.f32 %v522_v5, %v475_v33  ;;  %v860_v47 = vsel %vm561_vm11, %v859_v44, %v858_v21  ;;  %v1734_v24 = vmov 0   ;;  %v540_v26 = vsel %vm539_vm15, %v538_v25, %v1801_v2 }
 0x440   :  { %1544 = vset.pattern.permute.xlu2 %v1734_v24  ;;  %1545 = vset.pattern.permute.xlu0 %v1734_v24  ;;  %v2042_v27 = vsel %vm541_vm0, %v540_v26, %v1839_v29  ;;  %v1737_v44 = vmov 7  }
 0x441   :  { %v536_v48 = vadd.f32 %v1546_v30, %v528_v45  ;;  %v637_v45 = vsel %vm544_vm6, 0, %v1737_v44 }
 0x442   :  { %v596_v59 = vpop.f32.mrf.mxu2 }
 0x443   :  { %v563_v55 = vrot.slane %v536_v48, 5  ;;  %v572_v56 = vrot.slane %v536_v48, 4  ;;  %v659_v57 = vrot.slane %v536_v48, 6  ;;  %v667_v58 = vrot.slane %v536_v48, 3 }
 0x444   :  { %v756_v60 = vrot.slane %v536_v48, 7  ;;  %v764_v30 = vrot.slane %v536_v48, 2  ;;  %v1980_v52 = vsel %vm564_vm12, %v536_v48, %v853_v43  ;;  %v861_v61 = vrot.slane %v536_v48, 1 }
 0x445   :  { %v1983_v62 = vsel %vm564_vm12, %v563_v55, %v562_v53  ;;  %v1986_v63 = vsel %vm564_vm12, %v572_v56, %v571_v54  ;;  %v1989_v0 = vsel %vm564_vm12, %v659_v57, %v658_v40  ;;  %v1992_v3 = vsel %vm564_vm12, %v667_v58, %v666_v41 }
 0x446   :  { %v575_v6 = vsel %vm1973_vm13, %v1983_v62, %v1986_v63  ;;  %v670_v9 = vsel %vm1973_vm13, %v1989_v0, %v1992_v3  ;;  %v2003_v10 = vsel %vm564_vm12, %v756_v60, %v755_v35  ;;  %v2006_v11 = vsel %vm564_vm12, %v764_v30, %v763_v42 }
 0x447   :  { %v599_v12 = vadd.f32 %v596_v59, %v575_v6  ;;  %v767_v13 = vsel %vm1973_vm13, %v2003_v10, %v2006_v11  ;;  %v2013_v14 = vsel %vm564_vm12, %v861_v61, %v860_v47  ;;  %v1028_v15 = vsel %vm1973_vm13, %v2006_v11, %v2003_v10 }
 0x448   :  { %v864_v16 = vsel %vm1973_vm13, %v1980_v52, %v2013_v14  ;;  %v946_v17 = vsel %vm1973_vm13, %v2013_v14, %v1980_v52  ;;  %v1110_v18 = vsel %vm1973_vm13, %v1992_v3, %v1989_v0  ;;  %v1192_v19 = vsel %vm1973_vm13, %v1986_v63, %v1983_v62 }
 0x449   :  { %1564 = vtanh.f32 %v599_v12  ;;  %v1506_v21 = vmul.f32 -1.442695, %v599_v12 }
 0x44b   :  { %1566 = vpow2.f32 %v1506_v21 }
 0x44f   :  { %v1565_v20 = vpop.eup %1564 }
 0x450   :  { %622 = vrot.lane.b32.xlu2 %v1565_v20, %s1733_s4 }
 0x451   :  { %v1567_v22 = vpop.eup %1566 }
 0x452   :  { %v603_v23 = vadd.f32 1.0, %v1567_v22 }
 0x454   :  { %1568 = vrcp.f32 %v603_v23  ;;  %v615_v36 = vand.u32 2147483648, %v603_v23  ;;  %vm609_vm3 = vweird.f32 %v603_v23  ;;  %v613_v37 = vand.u32 2147483647, %v603_v23 }
 0x456   :  { %v616_v31 = vor.u32 1.1754944e-38, %v615_v36  ;;  %vm614_vm5 = vcmp.eq.f32.partialorder %v613_v37, 8.507059e+37  ;;  %v1738_v36 = vmov 6  }
 0x457   :  { %v736_v37 = vsel %vm544_vm6, 1, %v1738_v36 }
 0x458   :  { %639 = vperm.xlu2 %1544, %v2042_v27  }
 0x45a   :  { %v1569_v28 = vpop.eup %1568 }
 0x45b   :  { %v605_v32 = vmul.f32 %v1569_v28, %v603_v23  ;;  %vm610_vm2 = vweird.f32 %v1569_v28 }
 0x45c   :  { %vm611_vm4 = vmor %vm609_vm3, %vm610_vm2 }
 0x45d   :  { %v606_v7 = vsub.f32 1.0, %v605_v32 }
 0x45f   :  { %v607_v34 = vmul.f32 %v1569_v28, %v606_v7 }
 0x461   :  { %v608_v35 = vadd.f32 %v1569_v28, %v607_v34 }
 0x463   :  { %v612_v4 = vsel %vm611_vm4, %v1569_v28, %v608_v35 }
 0x464   :  { %v617_v2 = vsel %vm614_vm5, %v616_v31, %v612_v4 }
 0x465   :  { %v620_v29 = vmul.f32 0.0, %v617_v2 }
 0x4aa   :  { %v623_v33 = vpop.permute.xlu2 %622 }
 0x4ab   :  { %v625_v38 = vmul.f32 %v623_v33, %v617_v2 }
 0x4ad   :  { %627 = vrot.lane.b32.xlu0 %v625_v38, %s1733_s4 }
 0x4b2   :  { %v2048_v41 = vpop.permute.xlu2 %639 }
 0x4b3   :  { %vm641_vm7 = vcmp.lt.s32.totalorder %v637_v45, %v2048_v41  ;;  %vm737_vm12 = vcmp.lt.s32.totalorder %v736_v37, %v2048_v41 }
 0x51f   :  { %v628_v39 = vpop.permute.xlu0 %627 }
 0x520   :  { %v630_v40 = vadd.f32 %v628_v39, %v620_v29 }
 0x522   :  { %1570 = vtanh.f32 %v630_v40  ;;  %651 = vrot.lane.b32.xlu2 %v630_v40, %s1735_s13 }
 0x528   :  { %v1571_v5 = vpop.eup %1570 }
 0x529   :  { %633 = vrot.lane.b32.xlu1 %v1571_v5, %s1733_s4 }
 0x57c   :  { %v652_v46 = vpop.permute.xlu2 %651 }
 0x57d   :  { %v654_v47 = vsel %vm641_vm7, %v652_v46, 0.0 }
 0x59b   :  { %v634_v42 = vpop.permute.xlu1 %633 }
 0x59c   :  { %v636_v43 = vmul.f32 %v634_v42, %v617_v2 }
 0x59e   :  { %643 = vrot.lane.b32.xlu0 %v636_v43, %s1736_s14 }
 0x5a6   :  { %716 = vrot.lane.b32.xlu0 %v654_v47, %s1733_s4 }
 0x610   :  { %v644_v48 = vpop.permute.xlu0 %643 }
 0x611   :  { %v2060_v49 = vsel %vm641_vm7, %v644_v48, 0.0  ;;  %v648_v33 = vsel %vm641_vm7, %v644_v48, -1e+30 }
 0x612   :  { %1507 = vmatmul.msk.f32.vlgmr.msrb.gmra.mxu3 %vm93_vm1, %v2060_v49  ;;  %v649_v2 = vmax.f32 %v648_v33, -1e+30 }
 0x618   :  { %v717_v25 = vpop.permute.xlu0 %716 }
 0x695   :  { %v691_v50 = vpop.f32.mrf.mxu3 }
 0x696   :  { %v694_v53 = vadd.f32 %v691_v50, %v670_v9 }
 0x698   :  { %1572 = vtanh.f32 %v694_v53  ;;  %v1508_v55 = vmul.f32 -1.442695, %v694_v53 }
 0x69a   :  { %1574 = vpow2.f32 %v1508_v55 }
 0x69e   :  { %v1573_v54 = vpop.eup %1572 }
 0x69f   :  { %721 = vrot.lane.b32.xlu1 %v1573_v54, %s1733_s4 }
 0x6a0   :  { %v1575_v56 = vpop.eup %1574 }
 0x6a1   :  { %v698_v57 = vadd.f32 1.0, %v1575_v56 }
 0x6a3   :  { %1576 = vrcp.f32 %v698_v57  ;;  %v710_v6 = vand.u32 2147483648, %v698_v57  ;;  %vm704_vm9 = vweird.f32 %v698_v57  ;;  %v708_v12 = vand.u32 2147483647, %v698_v57 }
 0x6a5   :  { %v711_v20 = vor.u32 1.1754944e-38, %v710_v6  ;;  %vm709_vm11 = vcmp.eq.f32.partialorder %v708_v12, 8.507059e+37 }
 0x6a9   :  { %v1577_v58 = vpop.eup %1576 }
 0x6aa   :  { %v700_v59 = vmul.f32 %v1577_v58, %v698_v57  ;;  %vm705_vm8 = vweird.f32 %v1577_v58 }
 0x6ab   :  { %vm706_vm10 = vmor %vm704_vm9, %vm705_vm8 }
 0x6ac   :  { %v701_v60 = vsub.f32 1.0, %v700_v59 }
 0x6ae   :  { %v702_v30 = vmul.f32 %v1577_v58, %v701_v60 }
 0x6b0   :  { %v703_v61 = vadd.f32 %v1577_v58, %v702_v30 }
 0x6b2   :  { %v707_v9 = vsel %vm706_vm10, %v1577_v58, %v703_v61 }
 0x6b3   :  { %v712_v22 = vsel %vm709_vm11, %v711_v20, %v707_v9 }
 0x6b4   :  { %v719_v26 = vmul.f32 %v717_v25, %v712_v22 }
 0x711   :  { %v722_v21 = vpop.permute.xlu1 %721 }
 0x712   :  { %v724_v23 = vmul.f32 %v722_v21, %v712_v22 }
 0x714   :  { %726 = vrot.lane.b32.xlu2 %v724_v23, %s1733_s4 }
 0x76e   :  { %v727_v28 = vpop.permute.xlu2 %726 }
 0x76f   :  { %v729_v32 = vadd.f32 %v727_v28, %v719_v26 }
 0x771   :  { %1578 = vtanh.f32 %v729_v32  ;;  %748 = vrot.lane.b32.xlu2 %v729_v32, %s1735_s13 }
 0x777   :  { %v1579_v7 = vpop.eup %1578 }
 0x778   :  { %732 = vrot.lane.b32.xlu1 %v1579_v7, %s1733_s4 }
 0x7cb   :  { %v749_v4 = vpop.permute.xlu2 %748 }
 0x7cc   :  { %v751_v31 = vsel %vm737_vm12, %v749_v4, %v654_v47 }
 0x7ea   :  { %v733_v34 = vpop.permute.xlu1 %732 }
 0x7eb   :  { %v735_v35 = vmul.f32 %v733_v34, %v712_v22  ;;  %v1739_v22 = vmov 5  }
 0x7ec   :  { %v833_v23 = vsel %vm544_vm6, 2, %v1739_v22 }
 0x7ed   :  { %739 = vrot.lane.b32.xlu0 %v735_v35, %s1736_s14  ;;  %vm834_vm3 = vcmp.lt.s32.totalorder %v833_v23, %v2048_v41 }
 0x7f5   :  { %813 = vrot.lane.b32.xlu0 %v751_v31, %s1733_s4 }
 0x85f   :  { %v740_v38 = vpop.permute.xlu0 %739 }
 0x860   :  { %v744_v29 = vsel %vm737_vm12, %v740_v38, -1e+30  ;;  %v746_v39 = vsel %vm737_vm12, %v740_v38, %v2060_v49  ;;  %v742_v28 = vsel %vm737_vm12, %v740_v38, 0.0 }
 0x861   :  { %v2087_v40 = vmax.f32 %v649_v2, %v744_v29  ;;  %1509 = vmatmul.msk.f32.vlgmr.msrb.gmra.mxu0 %vm93_vm1, %v746_v39  ;;  %v743_v32 = vadd.f32 %v742_v28, %v2060_v49 }
 0x867   :  { %v814_v30 = vpop.permute.xlu0 %813 }
 0x8de   :  { %v788_v5 = vpop.f32.mrf.mxu0 }
 0x8df   :  { %v791_v42 = vadd.f32 %v788_v5, %v767_v13 }
 0x8e1   :  { %1580 = vtanh.f32 %v791_v42  ;;  %v1510_v44 = vmul.f32 -1.442695, %v791_v42 }
 0x8e3   :  { %1582 = vpow2.f32 %v1510_v44 }
 0x8e7   :  { %v1581_v43 = vpop.eup %1580 }
 0x8e8   :  { %818 = vrot.lane.b32.xlu1 %v1581_v43, %s1733_s4 }
 0x8e9   :  { %v1583_v45 = vpop.eup %1582 }
 0x8ea   :  { %v795_v46 = vadd.f32 1.0, %v1583_v45 }
 0x8ec   :  { %1584 = vrcp.f32 %v795_v46  ;;  %v807_v55 = vand.u32 2147483648, %v795_v46  ;;  %vm801_vm15 = vweird.f32 %v795_v46  ;;  %v805_v56 = vand.u32 2147483647, %v795_v46 }
 0x8ee   :  { %v808_v57 = vor.u32 1.1754944e-38, %v807_v55  ;;  %vm806_vm2 = vcmp.eq.f32.partialorder %v805_v56, 8.507059e+37 }
 0x8f2   :  { %v1585_v47 = vpop.eup %1584 }
 0x8f3   :  { %v797_v48 = vmul.f32 %v1585_v47, %v795_v46  ;;  %vm802_vm14 = vweird.f32 %v1585_v47 }
 0x8f4   :  { %vm803_vm0 = vmor %vm801_vm15, %vm802_vm14 }
 0x8f5   :  { %v798_v50 = vsub.f32 1.0, %v797_v48 }
 0x8f7   :  { %v799_v53 = vmul.f32 %v1585_v47, %v798_v50 }
 0x8f9   :  { %v800_v54 = vadd.f32 %v1585_v47, %v799_v53 }
 0x8fb   :  { %v804_v13 = vsel %vm803_vm0, %v1585_v47, %v800_v54 }
 0x8fc   :  { %v809_v59 = vsel %vm806_vm2, %v808_v57, %v804_v13 }
 0x8fd   :  { %v816_v61 = vmul.f32 %v814_v30, %v809_v59 }
 0x95a   :  { %v819_v58 = vpop.permute.xlu1 %818 }
 0x95b   :  { %v821_v60 = vmul.f32 %v819_v58, %v809_v59 }
 0x95d   :  { %823 = vrot.lane.b32.xlu2 %v821_v60, %s1733_s4 }
 0x9b7   :  { %v824_v6 = vpop.permute.xlu2 %823 }
 0x9b8   :  { %v826_v12 = vadd.f32 %v824_v6, %v816_v61 }
 0x9ba   :  { %1586 = vtanh.f32 %v826_v12  ;;  %845 = vrot.lane.b32.xlu2 %v826_v12, %s1735_s13 }
 0x9c0   :  { %v1587_v9 = vpop.eup %1586 }
 0x9c1   :  { %829 = vrot.lane.b32.xlu1 %v1587_v9, %s1733_s4 }
 0xa14   :  { %v846_v25 = vpop.permute.xlu2 %845 }
 0xa15   :  { %v848_v26 = vsel %vm834_vm3, %v846_v25, %v751_v31 }
 0xa33   :  { %v830_v20 = vpop.permute.xlu1 %829 }
 0xa34   :  { %v832_v21 = vmul.f32 %v830_v20, %v809_v59  ;;  %v1740_v59 = vmov 4  }
 0xa35   :  { %v930_v60 = vsel %vm544_vm6, 3, %v1740_v59 }
 0xa36   :  { %836 = vrot.lane.b32.xlu0 %v832_v21, %s1736_s14  ;;  %vm931_vm9 = vcmp.lt.s32.totalorder %v930_v60, %v2048_v41 }
 0xa3e   :  { %910 = vrot.lane.b32.xlu0 %v848_v26, %s1733_s4 }
 0xaa8   :  { %v837_v7 = vpop.permute.xlu0 %836 }
 0xaa9   :  { %v839_v34 = vsel %vm834_vm3, %v837_v7, 0.0  ;;  %v841_v35 = vsel %vm834_vm3, %v837_v7, -1e+30  ;;  %v843_v36 = vsel %vm834_vm3, %v837_v7, %v746_v39 }
 0xaaa   :  { %v840_v4 = vadd.f32 %v839_v34, %v743_v32  ;;  %v842_v33 = vmax.f32 %v2087_v40, %v841_v35  ;;  %1511 = vmatmul.msk.f32.vlgmr.msrb.gmra.mxu1 %vm93_vm1, %v843_v36 }
 0xab0   :  { %v911_v53 = vpop.permute.xlu0 %910 }
 0xb27   :  { %v885_v2 = vpop.f32.mrf.mxu1 }
 0xb28   :  { %v888_v31 = vadd.f32 %v885_v2, %v864_v16 }
 0xb2a   :  { %1588 = vtanh.f32 %v888_v31  ;;  %v1512_v49 = vmul.f32 -1.442695, %v888_v31 }
 0xb2c   :  { %1590 = vpow2.f32 %v1512_v49 }
 0xb30   :  { %v1589_v37 = vpop.eup %1588 }
 0xb31   :  { %915 = vrot.lane.b32.xlu1 %v1589_v37, %s1733_s4 }
 0xb32   :  { %v1591_v38 = vpop.eup %1590 }
 0xb33   :  { %v892_v29 = vadd.f32 1.0, %v1591_v38 }
 0xb35   :  { %1592 = vrcp.f32 %v892_v29  ;;  %v904_v44 = vand.u32 2147483648, %v892_v29  ;;  %vm898_vm5 = vweird.f32 %v892_v29  ;;  %v902_v45 = vand.u32 2147483647, %v892_v29 }
 0xb37   :  { %v905_v46 = vor.u32 1.1754944e-38, %v904_v44  ;;  %vm903_vm8 = vcmp.eq.f32.partialorder %v902_v45, 8.507059e+37  ;;  %v1741_v44 = vmov 3  }
 0xb38   :  { %v1012_v45 = vsel %vm544_vm6, 4, %v1741_v44 }
 0xb39   :  { %vm1013_vm15 = vcmp.lt.s32.totalorder %v1012_v45, %v2048_v41 }
 0xb3b   :  { %v1593_v39 = vpop.eup %1592 }
 0xb3c   :  { %v894_v40 = vmul.f32 %v1593_v39, %v892_v29  ;;  %vm899_vm4 = vweird.f32 %v1593_v39 }
 0xb3d   :  { %vm900_vm7 = vmor %vm898_vm5, %vm899_vm4 }
 0xb3e   :  { %v895_v5 = vsub.f32 1.0, %v894_v40 }
 0xb40   :  { %v896_v42 = vmul.f32 %v1593_v39, %v895_v5 }
 0xb42   :  { %v897_v43 = vadd.f32 %v1593_v39, %v896_v42 }
 0xb44   :  { %v901_v16 = vsel %vm900_vm7, %v1593_v39, %v897_v43 }
 0xb45   :  { %v906_v48 = vsel %vm903_vm8, %v905_v46, %v901_v16 }
 0xb46   :  { %v913_v54 = vmul.f32 %v911_v53, %v906_v48 }
 0xba3   :  { %v916_v47 = vpop.permute.xlu1 %915 }
 0xba4   :  { %v918_v50 = vmul.f32 %v916_v47, %v906_v48 }
 0xba6   :  { %920 = vrot.lane.b32.xlu2 %v918_v50, %s1733_s4 }
 0xc00   :  { %v921_v55 = vpop.permute.xlu2 %920 }
 0xc01   :  { %v923_v56 = vadd.f32 %v921_v55, %v913_v54 }
 0xc03   :  { %1594 = vtanh.f32 %v923_v56  ;;  %942 = vrot.lane.b32.xlu2 %v923_v56, %s1735_s13 }
 0xc09   :  { %v1595_v13 = vpop.eup %1594 }
 0xc0a   :  { %926 = vrot.lane.b32.xlu1 %v1595_v13, %s1733_s4 }
 0xc5d   :  { %v943_v30 = vpop.permute.xlu2 %942 }
 0xc5e   :  { %v945_v61 = vsel %vm931_vm9, %v943_v30, %v848_v26 }
 0xc7c   :  { %v927_v57 = vpop.permute.xlu1 %926 }
 0xc7d   :  { %v929_v58 = vmul.f32 %v927_v57, %v906_v48 }
 0xc7f   :  { %933 = vrot.lane.b32.xlu0 %v929_v58, %s1736_s14 }
 0xc87   :  { %992 = vrot.lane.b32.xlu0 %v945_v61, %s1733_s4 }
 0xcf1   :  { %v934_v6 = vpop.permute.xlu0 %933 }
 0xcf2   :  { %v936_v12 = vsel %vm931_vm9, %v934_v6, 0.0  ;;  %v938_v9 = vsel %vm931_vm9, %v934_v6, -1e+30  ;;  %v940_v20 = vsel %vm931_vm9, %v934_v6, %v843_v36 }
 0xcf3   :  { %v937_v21 = vadd.f32 %v936_v12, %v840_v4  ;;  %v2123_v22 = vmax.f32 %v842_v33, %v938_v9  ;;  %1513 = vmatmul.msk.f32.vlgmr.msra.gmra.mxu2 %vm93_vm1, %v940_v20 }
 0xcf9   :  { %v993_v38 = vpop.permute.xlu0 %992 }
 0xd76   :  { %v967_v23 = vpop.f32.mrf.mxu2 }
 0xd77   :  { %v970_v25 = vadd.f32 %v967_v23, %v946_v17 }
 0xd79   :  { %1596 = vtanh.f32 %v970_v25  ;;  %v1514_v28 = vmul.f32 -1.442695, %v970_v25 }
 0xd7b   :  { %1598 = vpow2.f32 %v1514_v28 }
 0xd7f   :  { %v1597_v26 = vpop.eup %1596 }
 0xd80   :  { %997 = vrot.lane.b32.xlu1 %v1597_v26, %s1733_s4 }
 0xd81   :  { %v1599_v32 = vpop.eup %1598 }
 0xd82   :  { %v974_v7 = vadd.f32 1.0, %v1599_v32 }
 0xd84   :  { %1600 = vrcp.f32 %v974_v7  ;;  %v986_v2 = vand.u32 2147483648, %v974_v7  ;;  %vm980_vm11 = vweird.f32 %v974_v7  ;;  %v984_v31 = vand.u32 2147483647, %v974_v7 }
 0xd86   :  { %v987_v14 = vor.u32 1.1754944e-38, %v986_v2  ;;  %vm985_vm14 = vcmp.eq.f32.partialorder %v984_v31, 8.507059e+37 }
 0xd8a   :  { %v1601_v34 = vpop.eup %1600 }
 0xd8b   :  { %v976_v35 = vmul.f32 %v1601_v34, %v974_v7  ;;  %vm981_vm10 = vweird.f32 %v1601_v34 }
 0xd8c   :  { %vm982_vm12 = vmor %vm980_vm11, %vm981_vm10 }
 0xd8d   :  { %v977_v36 = vsub.f32 1.0, %v976_v35 }
 0xd8f   :  { %v978_v4 = vmul.f32 %v1601_v34, %v977_v36  ;;  %v1742_v36 = vmov 2  }
 0xd91   :  { %v979_v33 = vadd.f32 %v1601_v34, %v978_v4  ;;  %v1094_v4 = vsel %vm544_vm6, 5, %v1742_v36  ;;  %v1274_v36 = vstv %s2282_s1 }
 0xd92   :  { %vm1095_vm5 = vcmp.lt.s32.totalorder %v1094_v4, %v2048_v41 }
 0xd93   :  { %v983_v52 = vsel %vm982_vm12, %v1601_v34, %v979_v33 }
 0xd94   :  { %v988_v37 = vsel %vm985_vm14, %v987_v14, %v983_v52  ;;  %vm1272_vm14 = vcmp.lt.s32.totalorder %v1798_v1, 2 }
 0xd95   :  { %v995_v29 = vmul.f32 %v993_v38, %v988_v37 }
 0xdf2   :  { %v998_v17 = vpop.permute.xlu1 %997 }
 0xdf3   :  { %v1000_v49 = vmul.f32 %v998_v17, %v988_v37 }
 0xdf5   :  { %1002 = vrot.lane.b32.xlu2 %v1000_v49, %s1733_s4 }
 0xe4f   :  { %v1003_v39 = vpop.permute.xlu2 %1002 }
 0xe50   :  { %v1005_v40 = vadd.f32 %v1003_v39, %v995_v29 }
 0xe52   :  { %1602 = vtanh.f32 %v1005_v40  ;;  %1024 = vrot.lane.b32.xlu2 %v1005_v40, %s1735_s13 }
 0xe58   :  { %v1603_v5 = vpop.eup %1602 }
 0xe59   :  { %1008 = vrot.lane.b32.xlu1 %v1603_v5, %s1733_s4 }
 0xeac   :  { %v1025_v16 = vpop.permute.xlu2 %1024 }
 0xead   :  { %v1027_v46 = vsel %vm1013_vm15, %v1025_v16, %v945_v61 }
 0xecb   :  { %v1009_v42 = vpop.permute.xlu1 %1008 }
 0xecc   :  { %v1011_v43 = vmul.f32 %v1009_v42, %v988_v37 }
 0xece   :  { %1015 = vrot.lane.b32.xlu0 %v1011_v43, %s1736_s14 }
 0xed6   :  { %1074 = vrot.lane.b32.xlu0 %v1027_v46, %s1733_s4 }
 0xf40   :  { %v1016_v47 = vpop.permute.xlu0 %1015 }
 0xf41   :  { %v1018_v48 = vsel %vm1013_vm15, %v1016_v47, 0.0  ;;  %v1020_v50 = vsel %vm1013_vm15, %v1016_v47, -1e+30  ;;  %v1022_v53 = vsel %vm1013_vm15, %v1016_v47, %v940_v20 }
 0xf42   :  { %v1019_v54 = vadd.f32 %v1018_v48, %v937_v21  ;;  %v1021_v55 = vmax.f32 %v2123_v22, %v1020_v50  ;;  %1515 = vmatmul.msk.f32.vlgmr.msra.gmra.mxu3 %vm93_vm1, %v1022_v53 }
 0xf48   :  { %v1075_v25 = vpop.permute.xlu0 %1074 }
 0xfc5   :  { %v1049_v56 = vpop.f32.mrf.mxu3 }
 0xfc6   :  { %v1052_v13 = vadd.f32 %v1049_v56, %v1028_v15 }
 0xfc8   :  { %1604 = vtanh.f32 %v1052_v13  ;;  %v1516_v58 = vmul.f32 -1.442695, %v1052_v13 }
 0xfca   :  { %1606 = vpow2.f32 %v1516_v58 }
 0xfce   :  { %v1605_v57 = vpop.eup %1604 }
 0xfcf   :  { %1079 = vrot.lane.b32.xlu1 %v1605_v57, %s1733_s4 }
 0xfd0   :  { %v1607_v59 = vpop.eup %1606 }
 0xfd1   :  { %v1056_v60 = vadd.f32 1.0, %v1607_v59 }
 0xfd3   :  { %1608 = vrcp.f32 %v1056_v60  ;;  %v1068_v20 = vand.u32 2147483648, %v1056_v60  ;;  %vm1062_vm2 = vweird.f32 %v1056_v60  ;;  %v1066_v21 = vand.u32 2147483647, %v1056_v60 }
 0xfd5   :  { %v1069_v11 = vor.u32 1.1754944e-38, %v1068_v20  ;;  %vm1067_vm4 = vcmp.eq.f32.partialorder %v1066_v21, 8.507059e+37 }
 0xfd9   :  { %v1609_v30 = vpop.eup %1608 }
 0xfda   :  { %v1058_v61 = vmul.f32 %v1609_v30, %v1056_v60  ;;  %vm1063_vm0 = vweird.f32 %v1609_v30  ;;  %v1743_v60 = vmov 1  }
 0xfdb   :  { %vm1064_vm3 = vmor %vm1062_vm2, %vm1063_vm0 }
 0xfdc   :  { %v1059_v6 = vsub.f32 1.0, %v1058_v61 }
 0xfde   :  { %v1060_v12 = vmul.f32 %v1609_v30, %v1059_v6 }
 0xfe0   :  { %v1061_v9 = vadd.f32 %v1609_v30, %v1060_v12 }
 0xfe2   :  { %v1065_v10 = vsel %vm1064_vm3, %v1609_v30, %v1061_v9  ;;  %v1176_v30 = vsel %vm544_vm6, 6, %v1743_v60 }
 0xfe3   :  { %v1070_v22 = vsel %vm1067_vm4, %v1069_v11, %v1065_v10  ;;  %vm1177_vm11 = vcmp.lt.s32.totalorder %v1176_v30, %v2048_v41 }
 0xfe4   :  { %v1077_v26 = vmul.f32 %v1075_v25, %v1070_v22 }
0x1041   :  { %v1080_v15 = vpop.permute.xlu1 %1079 }
0x1042   :  { %v1082_v23 = vmul.f32 %v1080_v15, %v1070_v22 }
0x1044   :  { %1084 = vrot.lane.b32.xlu2 %v1082_v23, %s1733_s4 }
0x109e   :  { %v1085_v28 = vpop.permute.xlu2 %1084 }
0x109f   :  { %v1087_v32 = vadd.f32 %v1085_v28, %v1077_v26 }
0x10a1   :  { %1610 = vtanh.f32 %v1087_v32  ;;  %1106 = vrot.lane.b32.xlu2 %v1087_v32, %s1735_s13 }
0x10a7   :  { %v1611_v7 = vpop.eup %1610 }
0x10a8   :  { %1090 = vrot.lane.b32.xlu1 %v1611_v7, %s1733_s4 }
0x10fb   :  { %v1107_v33 = vpop.permute.xlu2 %1106 }
0x10fc   :  { %v1109_v2 = vsel %vm1095_vm5, %v1107_v33, %v1027_v46 }
0x111a   :  { %v1091_v34 = vpop.permute.xlu1 %1090 }
0x111b   :  { %v1093_v35 = vmul.f32 %v1091_v34, %v1070_v22 }
0x111d   :  { %1097 = vrot.lane.b32.xlu0 %v1093_v35, %s1736_s14  ;;  %v1273_v35 = vstv %s2280_s17 }
0x1125   :  { %1156 = vrot.lane.b32.xlu0 %v1109_v2, %s1733_s4 }
0x118f   :  { %v1098_v31 = vpop.permute.xlu0 %1097 }
0x1190   :  { %v1100_v52 = vsel %vm1095_vm5, %v1098_v31, 0.0  ;;  %v1102_v14 = vsel %vm1095_vm5, %v1098_v31, -1e+30  ;;  %v1104_v17 = vsel %vm1095_vm5, %v1098_v31, %v1022_v53 }
0x1191   :  { %v1101_v37 = vadd.f32 %v1100_v52, %v1019_v54  ;;  %v2156_v49 = vmax.f32 %v1021_v55, %v1102_v14  ;;  %1517 = vmatmul.msk.f32.vlgmr.msra.gmra.mxu0 %vm93_vm1, %v1104_v17  ;;  %v543_v14 = vcvt.s32.f32 %v2042_v27  ;;  %v1307_v27 = vld [vmem:[%s2274_s5 + $0x38] sm:$0xff] }
0x1192   :  { %1331 = vmatpush.msrb.mxu2 %v1307_v27 }
0x1197   :  { %v1157_v54 = vpop.permute.xlu0 %1156 }
0x120e   :  { %v1131_v38 = vpop.f32.mrf.mxu0 }
0x120f   :  { %v1134_v29 = vadd.f32 %v1131_v38, %v1110_v18 }
0x1211   :  { %1612 = vtanh.f32 %v1134_v29  ;;  %v1518_v40 = vmul.f32 -1.442695, %v1134_v29 }
0x1213   :  { %1614 = vpow2.f32 %v1518_v40 }
0x1217   :  { %v1613_v39 = vpop.eup %1612 }
0x1218   :  { %1161 = vrot.lane.b32.xlu1 %v1613_v39, %s1733_s4 }
0x1219   :  { %v1615_v5 = vpop.eup %1614 }
0x121a   :  { %v1138_v42 = vadd.f32 1.0, %v1615_v5 }
0x121c   :  { %1616 = vrcp.f32 %v1138_v42  ;;  %v1150_v47 = vand.u32 2147483648, %v1138_v42  ;;  %vm1144_vm8 = vweird.f32 %v1138_v42  ;;  %v1148_v48 = vand.u32 2147483647, %v1138_v42 }
0x121e   :  { %v1151_v3 = vor.u32 1.1754944e-38, %v1150_v47  ;;  %vm1149_vm10 = vcmp.eq.f32.partialorder %v1148_v48, 8.507059e+37  ;;  %v1315_v47 = vld [vmem:[%s2274_s5 + $0x78] sm:$0xff]  ;;  %v1301_v48 = vld [vmem:[%s2274_s5 + $0x8] sm:$0xff] }
0x121f   :  { %1401 = vmatpush.msrb.mxu1 %v1315_v47 }
0x1222   :  { %v1617_v43 = vpop.eup %1616 }
0x1223   :  { %v1140_v44 = vmul.f32 %v1617_v43, %v1138_v42  ;;  %vm1145_vm7 = vweird.f32 %v1617_v43  ;;  %v1303_v42 = vld [vmem:[%s2274_s5 + $0x18] sm:$0xff] }
0x1224   :  { %vm1146_vm9 = vmor %vm1144_vm8, %vm1145_vm7  ;;  %1354 = vmatpush.msrb.mxu3 %v1303_v42 }
0x1225   :  { %v1141_v45 = vsub.f32 1.0, %v1140_v44 }
0x1227   :  { %v1142_v16 = vmul.f32 %v1617_v43, %v1141_v45  ;;  %v1302_v45 = vld [vmem:[%s2274_s5 + $0x10] sm:$0xff] }
0x1228   :  { %1355 = vmatpush.msrb.mxu3 %v1302_v45 }
0x1229   :  { %v1143_v46 = vadd.f32 %v1617_v43, %v1142_v16  ;;  %v1311_v16 = vld [vmem:[%s2274_s5 + $0x58] sm:$0xff] }
0x122a   :  { %1377 = vmatpush.msrb.mxu0 %v1311_v16  ;;  %1356 = vmatpush.msrb.mxu3 %v1301_v48 }
0x122b   :  { %v1147_v0 = vsel %vm1146_vm9, %v1617_v43, %v1143_v46  ;;  %v1306_v46 = vld [vmem:[%s2274_s5 + $0x30] sm:$0xff] }
0x122c   :  { %v1152_v50 = vsel %vm1149_vm10, %v1151_v3, %v1147_v0  ;;  %1332 = vmatpush.msrb.mxu2 %v1306_v46  ;;  %v1310_v0 = vld [vmem:[%s2274_s5 + $0x50] sm:$0xff]  ;;  %v1305_v3 = vld [vmem:[%s2274_s5 + $0x28] sm:$0xff] }
0x122d   :  { %v1159_v55 = vmul.f32 %v1157_v54, %v1152_v50  ;;  %1378 = vmatpush.msrb.mxu0 %v1310_v0  ;;  %v1309_v54 = vld [vmem:[%s2274_s5 + $0x48] sm:$0xff] }
0x122e   :  { %1333 = vmatpush.msrb.mxu2 %v1305_v3 }
0x122f   :  { %1379 = vmatpush.msrb.mxu0 %v1309_v54 }
0x128a   :  { %v1162_v18 = vpop.permute.xlu1 %1161 }
0x128b   :  { %v1164_v53 = vmul.f32 %v1162_v18, %v1152_v50  ;;  %v1314_v18 = vld [vmem:[%s2274_s5 + $0x70] sm:$0xff] }
0x128c   :  { %1402 = vmatpush.msrb.mxu1 %v1314_v18 }
0x128d   :  { %1166 = vrot.lane.b32.xlu2 %v1164_v53, %s1733_s4  ;;  %v1300_v53 = vld [vmem:[%s2274_s5] sm:$0xff] }
0x128e   :  { %1357 = vmatpush.msrb.mxu3 %v1300_v53 }
0x12e7   :  { %v1167_v56 = vpop.permute.xlu2 %1166 }
0x12e8   :  { %v1169_v13 = vadd.f32 %v1167_v56, %v1159_v55  ;;  %v1313_v55 = vld [vmem:[%s2274_s5 + $0x68] sm:$0xff]  ;;  %v1308_v56 = vld [vmem:[%s2274_s5 + $0x40] sm:$0xff] }
0x12e9   :  { %1403 = vmatpush.msrb.mxu1 %v1313_v55  ;;  %1380 = vmatpush.msrb.mxu0 %v1308_v56 }
0x12ea   :  { %1618 = vtanh.f32 %v1169_v13  ;;  %1188 = vrot.lane.b32.xlu2 %v1169_v13, %s1735_s13  ;;  %v1312_v13 = vld [vmem:[%s2274_s5 + $0x60] sm:$0xff] }
0x12eb   :  { %1404 = vmatpush.msrb.mxu1 %v1312_v13 }
0x12f0   :  { %v1619_v57 = vpop.eup %1618 }
0x12f1   :  { %1172 = vrot.lane.b32.xlu1 %v1619_v57, %s1733_s4 }
0x1344   :  { %v1189_v61 = vpop.permute.xlu2 %1188 }
0x1345   :  { %v1191_v6 = vsel %vm1177_vm11, %v1189_v61, %v1109_v2  ;;  %v1275_v2 = vsel %vm1272_vm14, %v1273_v35, %v1274_v36 }
0x1363   :  { %v1173_v58 = vpop.permute.xlu1 %1172 }
0x1364   :  { %v1175_v59 = vmul.f32 %v1173_v58, %v1152_v50  ;;  %v1304_v50 = vld [vmem:[%s2274_s5 + $0x20] sm:$0xff] }
0x1365   :  { %1334 = vmatpush.msrb.mxu2 %v1304_v50 }
0x1366   :  { %1179 = vrot.lane.b32.xlu0 %v1175_v59, %s1736_s14 }
0x136e   :  { %1238 = vrot.lane.b32.xlu0 %v1191_v6, %s1733_s4 }
0x13d8   :  { %v1180_v12 = vpop.permute.xlu0 %1179 }
0x13d9   :  { %v1182_v9 = vsel %vm1177_vm11, %v1180_v12, 0.0  ;;  %v2173_v20 = vsel %vm1177_vm11, %v1180_v12, -1e+30  ;;  %v1186_v21 = vsel %vm1177_vm11, %v1180_v12, %v1104_v17  ;;  %v1258_v12 = vsel %vm544_vm6, 7, %v1734_v24 }
0x13da   :  { %v2175_v10 = vadd.f32 %v1182_v9, %v1101_v37  ;;  %v1185_v11 = vmax.f32 %v2156_v49, %v2173_v20  ;;  %1519 = vmatmul.msk.f32.vlgmr.msra.gmra.mxu1 %vm93_vm1, %v1186_v21  ;;  %v1276_v37 = vcvt.s32.f32 %v1275_v2  ;;  %vm1259_vm8 = vcmp.lt.s32.totalorder %v1258_v12, %v2048_v41  ;;  %v1547_v20 = vld [vmem:[%s2275_s6] ss:$0 sm:$0xff]  ;;  %s1744_s6 = smov [#allocation9]  }
0x13db   :  { %vm1415_vm6 = vcmask 25600   ;;  %s1446_s16 = sshll.u32 %s1744_s6, 4  ;;  %s1447_s16 = int_to_ptr.vmem [resolvable:$true] %s1446_s16 }
0x13dc   :  { %vm1292_vm2 = vcmp.lt.f32.partialorder %v543_v14, %v1276_v37  ;;  %vm1282_vm3 = vweird.f32 %v1276_v37  ;;  %v1288_v30 = vand.u32 2147483648, %v1276_v37  ;;  %v1286_v6 = vand.u32 2147483647, %v1276_v37 }
0x13dd   :  { %v1294_v38 = vsel %vm1292_vm2, 1, %v1734_v24 }
0x13de   :  { %v1289_v9 = vor.u32 1.1754944e-38, %v1288_v30  ;;  %vm1287_vm7 = vcmp.eq.f32.partialorder %v1286_v6, 8.507059e+37 }
0x13e0   :  { %v1239_v1 = vpop.permute.xlu0 %1238 }
0x1457   :  { %v1213_v15 = vpop.f32.mrf.mxu1 }
0x1458   :  { %v1216_v22 = vadd.f32 %v1213_v15, %v1192_v19 }
0x145a   :  { %1620 = vtanh.f32 %v1216_v22  ;;  %v1520_v25 = vmul.f32 -1.442695, %v1216_v22 }
0x145c   :  { %1622 = vpow2.f32 %v1520_v25 }
0x1460   :  { %v1621_v23 = vpop.eup %1620 }
0x1461   :  { %1243 = vrot.lane.b32.xlu1 %v1621_v23, %s1733_s4 }
0x1462   :  { %v1623_v26 = vpop.eup %1622 }
0x1463   :  { %v1220_v28 = vadd.f32 1.0, %v1623_v26 }
0x1465   :  { %1624 = vrcp.f32 %v1220_v28  ;;  %vm1226_vm12 = vweird.f32 %v1220_v28  ;;  %v1232_v19 = vand.u32 2147483648, %v1220_v28  ;;  %v1230_v34 = vand.u32 2147483647, %v1220_v28 }
0x1467   :  { %v1233_v33 = vor.u32 1.1754944e-38, %v1232_v19  ;;  %vm1231_vm0 = vcmp.eq.f32.partialorder %v1230_v34, 8.507059e+37 }
0x146b   :  { %v1625_v32 = vpop.eup %1624 }
0x146c   :  { %v1222_v7 = vmul.f32 %v1625_v32, %v1220_v28  ;;  %vm1227_vm13 = vweird.f32 %v1625_v32 }
0x146d   :  { %vm1228_vm15 = vmor %vm1226_vm12, %vm1227_vm13 }
0x146e   :  { %v1223_v51 = vsub.f32 1.0, %v1222_v7 }
0x1470   :  { %v1224_v62 = vmul.f32 %v1625_v32, %v1223_v51 }
0x1472   :  { %v1225_v63 = vadd.f32 %v1625_v32, %v1224_v62 }
0x1474   :  { %v1229_v4 = vsel %vm1228_vm15, %v1625_v32, %v1225_v63 }
0x1475   :  { %v1234_v52 = vsel %vm1231_vm0, %v1233_v33, %v1229_v4 }
0x1476   :  { %v1241_v29 = vmul.f32 %v1239_v1, %v1234_v52 }
0x14d3   :  { %v1244_v31 = vpop.permute.xlu1 %1243 }
0x14d4   :  { %v1246_v17 = vmul.f32 %v1244_v31, %v1234_v52 }
0x14d6   :  { %1248 = vrot.lane.b32.xlu2 %v1246_v17, %s1733_s4 }
0x14de   :  { %1296 = vperm.xlu2 %1544, %v1294_v38  }
0x1530   :  { %v1249_v39 = vpop.permute.xlu2 %1248 }
0x1531   :  { %v1251_v40 = vadd.f32 %v1249_v39, %v1241_v29 }
0x1533   :  { %1626 = vtanh.f32 %v1251_v40 }
0x1534   :  { %1628 = vrcp.f32 %v1276_v37 }
0x1538   :  { %v1297_v26 = vpop.permute.xlu2 %1296 }
0x1539   :  { %v1627_v5 = vpop.eup %1626  ;;  %vm1298_vm9 = vcmp.eq.s32.totalorder %v1297_v26, 1 }
0x153a   :  { %1254 = vrot.lane.b32.xlu1 %v1627_v5, %s1733_s4  ;;  %v1629_v57 = vpop.eup %1628 }
0x153b   :  { %v1278_v58 = vmul.f32 %v1629_v57, %v1276_v37  ;;  %vm1283_vm4 = vweird.f32 %v1629_v57 }
0x153c   :  { %vm1284_vm5 = vmor %vm1282_vm3, %vm1283_vm4 }
0x153d   :  { %v1279_v59 = vsub.f32 1.0, %v1278_v58 }
0x153f   :  { %v1280_v60 = vmul.f32 %v1629_v57, %v1279_v59 }
0x1541   :  { %v1281_v61 = vadd.f32 %v1629_v57, %v1280_v60 }
0x1543   :  { %v1285_v21 = vsel %vm1284_vm5, %v1629_v57, %v1281_v61 }
0x1544   :  { %v1290_v22 = vsel %vm1287_vm7, %v1289_v9, %v1285_v21 }
0x15ac   :  { %v1255_v43 = vpop.permute.xlu1 %1254 }
0x15ad   :  { %v1257_v44 = vmul.f32 %v1255_v43, %v1234_v52 }
0x15af   :  { %1261 = vrot.lane.b32.xlu0 %v1257_v44, %s1736_s14 }
0x1621   :  { %v1262_v15 = vpop.permute.xlu0 %1261 }
0x1622   :  { %v1264_v23 = vsel %vm1259_vm8, %v1262_v15, 0.0  ;;  %v1266_v25 = vsel %vm1259_vm8, %v1262_v15, -1e+30 }
0x1623   :  { %v1265_v28 = vadd.f32 %v1264_v23, %v2175_v10  ;;  %v1267_v32 = vmax.f32 %v1185_v11, %v1266_v25 }
0x1625   :  { %v1291_v7 = vmul.f32 %v1290_v22, %v1265_v28  ;;  %v1293_v51 = vmax.f32 %v1267_v32, 0.0 }
0x1627   :  { %v1362_v8 = vrot.slane %v1291_v7, 2  ;;  %1522 = vmatmul.msk.f32.vlgmr.msrb.gmra.mxu3 %vm93_vm1, %v1291_v7  ;;  %v1299_v24 = vsel %vm1298_vm9, %v1293_v51, %v1267_v32 }
0x1628   :  { %1521 = vmatmul.msk.f32.vlgmr.msrb.gmra.mxu2 %vm93_vm1, %v1299_v24  ;;  %v1386_v41 = vrot.slane %v1299_v24, 2 }
0x1629   :  { %1523 = vmatmul.msk.f32.vlgmr.msrb.gmra.mxu0 %vm93_vm1, %v1362_v8 }
0x162a   :  { %1524 = vmatmul.msk.f32.vlgmr.msrb.gmra.mxu1 %vm93_vm1, %v1386_v41 }
0x16a6   :  { %v1382_v19 = vpop.f32.mrf.mxu0 }
0x16a7   :  { %v1406_v11 = vpop.f32.mrf.mxu1 }
0x16aa   :  { %v1359_v62 = vpop.f32.mrf.mxu3 }
0x16ab   :  { %v1336_v10 = vpop.f32.mrf.mxu2 }
0x16ac   :  { %v1360_v63 = vadd.f32 %v1359_v62, %v1336_v10 }
0x16ae   :  { %v1385_v49 = vadd.f32 %v1382_v19, %v1360_v63 }
0x16b0   :  { %v1409_v34 = vadd.f32 %v1406_v11, %v1385_v49 }
0x16b2   :  { %v1414_v35 = vadd.f32 %v1547_v20, %v1409_v34 }
0x16b4   :  { %v1416_v36 = vsel %vm1415_vm6, %v1414_v35, -inf }
0x16b5   :  { %1417 = vmax.xlane.f32.xlu1 %v1416_v36 }
0x1728   :  { %v1418_v4 = vpop.xlane.xlu1 %1417 }
0x1729   :  { %v1419_v33 = vsub.f32 %v1414_v35, %v1418_v4 }
0x172b   :  { %v1420_v2 = vmul.f32 1.442695, %v1419_v33 }
0x172d   :  { %1630 = vpow2.f32 %v1420_v2 }
0x1733   :  { %v1631_v31 = vpop.eup %1630 }
0x1734   :  { %v1422_v52 = vsel %vm1415_vm6, %v1631_v31, 0.0 }
0x1735   :  { %1423 = vadd.xlane.f32.xlu0 %v1422_v52 }
0x17a8   :  { %v1424_v14 = vpop.xlane.xlu0 %1423 }
0x17a9   :  { %1632 = vrcp.f32 %v1424_v14  ;;  %v1436_v1 = vand.u32 2147483648, %v1424_v14  ;;  %v1434_v39 = vand.u32 2147483647, %v1424_v14  ;;  %vm1430_vm10 = vweird.f32 %v1424_v14 }
0x17ab   :  { %v1437_v5 = vor.u32 1.1754944e-38, %v1436_v1  ;;  %vm1435_vm13 = vcmp.eq.f32.partialorder %v1434_v39, 8.507059e+37 }
0x17af   :  { %v1633_v17 = vpop.eup %1632 }
0x17b0   :  { %v1426_v37 = vmul.f32 %v1633_v17, %v1424_v14  ;;  %vm1431_vm1 = vweird.f32 %v1633_v17 }
0x17b1   :  { %vm1432_vm11 = vmor %vm1430_vm10, %vm1431_vm1 }
0x17b2   :  { %v1427_v38 = vsub.f32 1.0, %v1426_v37 }
0x17b4   :  { %v1428_v29 = vmul.f32 %v1633_v17, %v1427_v38 }
0x17b6   :  { %v1429_v40 = vadd.f32 %v1633_v17, %v1428_v29 }
0x17b8   :  { %v1433_v27 = vsel %vm1432_vm11, %v1633_v17, %v1429_v40 }
0x17b9   :  { %v1438_v42 = vsel %vm1435_vm13, %v1437_v5, %v1433_v27 }
0x17ba   :  { %v1439_v43 = vmul.f32 %v1631_v31, %v1438_v42 }
0x17bc   :  { %1440 = vst.msk [vmem:[#allocation9] sm:$0x3] %vm1415_vm6, %v1439_v43 }
0x17bd   :  { %1451 = dma.vmem_to_hbm [thread:$0]  %s1447_s16, 32, %s1449_s19, [#allocation6]  }
0x17be   :  { %1724 = dma.done.wait [#allocation6], 32  }
0x17bf   :  { %1725 = vsyncadd [#allocation6], 4294967264 }
0x17c0   :  { %1456 = vsyncpa [#allocation5], 1 }
0x17c1   :  { %1457 = vsyncpa [#allocation8], 1 }
0x17c2   :  { %1458 = vsyncpa [#allocation6], 1 }

</bundles_post_ra>
